<compile_context>
chip_gen: v6e
topology: v6e:2x2x1
jax: 0.10.0
libtpu: 0.0.40
codegen_flags: <defaults>
</compile_context>

<pallas_src>
import functools
import math

import jax
import jax.numpy as jnp
from jax.experimental import pallas as pl
from jax.experimental.pallas import tpu as pltpu

LN_EPS = 1e-12  # HF Roberta layer_norm_eps


def _layer_norm(x, g, b):
    mu = jnp.mean(x, axis=-1, keepdims=True)
    var = jnp.mean((x - mu) ** 2, axis=-1, keepdims=True)
    return (x - mu) * jax.lax.rsqrt(var + LN_EPS) * g + b


def _gelu_tanh(x):
    # TODO(synk): HF Roberta default act is exact erf-GELU; tanh approximation kept
    # because erf has no reliable Mosaic lowering (tanh runs on the EUP).
    c = math.sqrt(2.0 / math.pi)
    return 0.5 * x * (1.0 + jnp.tanh(c * (x + 0.044715 * x * x * x)))


def transformer_layer_kernel(x_ref, mask_ref,
                             wqkv_ref, bqkv_ref,
                             wo_ref, bo_ref, g1_ref, b1_ref,
                             wi_ref, bi_ref, wo2_ref, bo2_ref, g2_ref, b2_ref,
                             o_ref, *, num_heads, ffn_chunk):
    bblk, S, H = x_ref.shape
    dh = H // num_heads

    x2 = x_ref[...].reshape(bblk * S, H).astype(jnp.float32)
    x2_bf = x2.astype(jnp.bfloat16)                    # MXU operand

    # Hoisted mask broadcast: materialized once, reused by every head
    # (JAX does not CSE broadcast_in_dim).
    mask = jnp.broadcast_to(mask_ref[...], (bblk, S, S))

    # Fused QKV projection: one MXU push with N = 3H, bf16 operands, f32 accumulation.
    # The 1/sqrt(dh) scale is folded into the Q columns at parameter-prep time.
    qkv = (jnp.dot(x2_bf, wqkv_ref[...], preferred_element_type=jnp.float32)
           + bqkv_ref[...]).reshape(bblk, S, 3 * H)

    # Multi-head attention.  Per-head static loop with single-batch-dim einsums
    # (known-good Mosaic lowering); per-head contexts are concatenated in-register
    # (no VMEM ctx scratch, no masked sub-128-lane vst.msk stores).
    # TODO(synk): fold heads into one 'bhqd,bhkd->bhqk' batched einsum once a
    # multi-batch-dim dot_general lowering is confirmed (removes the per-head lane
    # slices at production dh=64).
    # TODO(synk): switch to a key-tiled online softmax (flash-style) when
    # max_burst_length grows so the (bblk, S, S) logits never materialize.
    ctx_heads = []
    for h in range(num_heads):
        qh = qkv[:, :, h * dh:(h + 1) * dh].astype(jnp.bfloat16)
        kh = qkv[:, :, H + h * dh:H + (h + 1) * dh].astype(jnp.bfloat16)
        vh = qkv[:, :, 2 * H + h * dh:2 * H + (h + 1) * dh].astype(jnp.bfloat16)
        s = jnp.einsum("bqd,bkd->bqk", qh, kh,
                       preferred_element_type=jnp.float32) + mask
        s = s - jnp.max(s, axis=-1, keepdims=True)     # softmax stats in f32
        e = jnp.exp(s)
        # reciprocal on the EUP (otherwise-idle slot next to exp)
        p = e * pl.reciprocal(jnp.sum(e, axis=-1, keepdims=True), approx=True)
        ctx_heads.append(jnp.einsum("bqk,bkd->bqd", p.astype(jnp.bfloat16), vh,
                                    preferred_element_type=jnp.float32))
    ctx = jnp.concatenate(ctx_heads, axis=-1).reshape(bblk * S, H)

    # self-output: dense + residual + LayerNorm (stats in f32)
    attn_dense = (jnp.dot(ctx.astype(jnp.bfloat16), wo_ref[...],
                          preferred_element_type=jnp.float32) + bo_ref[...])
    attn_out = _layer_norm(attn_dense + x2, g1_ref[...], b1_ref[...])
    attn_bf = attn_out.astype(jnp.bfloat16)

    # FFN tiled over the intermediate dimension: GELU slab is (rows, ffn_chunk)
    # instead of (rows, I); f32 accumulator stays resident.
    i_dim = wi_ref.shape[1]
    ff_out = jnp.zeros((bblk * S, H), jnp.float32)
    for c in range(i_dim // ffn_chunk):
        lo = c * ffn_chunk
        ff_c = _gelu_tanh(
            jnp.dot(attn_bf, wi_ref[:, lo:lo + ffn_chunk],
                    preferred_element_type=jnp.float32)
            + bi_ref[:, lo:lo + ffn_chunk])
        ff_out = ff_out + jnp.dot(ff_c.astype(jnp.bfloat16),
                                  wo2_ref[lo:lo + ffn_chunk, :],
                                  preferred_element_type=jnp.float32)
    out = _layer_norm(ff_out + bo2_ref[...] + attn_out, g2_ref[...], b2_ref[...])

    o_ref[...] = out.reshape(bblk, S, H).astype(o_ref.dtype)


_PREPPED_ORDER = ("wqkv", "bqkv", "wo", "bo", "g1", "b1",
                  "wi", "bi", "wo2", "bo2", "g2", "b2")


def _largest_divisor_leq(n, cap):
    d = max(1, min(n, cap))
    while n % d:
        d -= 1
    return d


def _vmem_capacity_bytes():
    # Per-generation budget (v5e/v6e: 128 MiB, v7x: 64 MiB); conservative fallback.
    try:
        return int(pltpu.get_tpu_info().vmem_capacity_bytes)
    except Exception:
        return 64 * 1024 * 1024


def prepare_layer_params(p, num_heads):
    """One-time parameter prep: fuse QKV, fold 1/sqrt(dh) into the Q columns, cast
    matmul weights to bf16 (halves weight DMA + VMEM).  LayerNorm params and biases
    stay f32 so all elementwise math runs in f32 (incl. on v5e)."""
    H = p["wq"].shape[0]
    scale = 1.0 / math.sqrt(H // num_heads)
    wqkv = jnp.concatenate([p["wq"] * scale, p["wk"], p["wv"]], axis=1)
    bqkv = jnp.concatenate([p["bq"] * scale, p["bk"], p["bv"]], axis=1)
    return {
        "wqkv": wqkv.astype(jnp.bfloat16),
        "bqkv": bqkv.astype(jnp.float32),
        "wo": p["wo"].astype(jnp.bfloat16), "bo": p["bo"].astype(jnp.float32),
        "g1": p["g1"].astype(jnp.float32), "b1": p["b1"].astype(jnp.float32),
        "wi": p["wi"].astype(jnp.bfloat16), "bi": p["bi"].astype(jnp.float32),
        "wo2": p["wo2"].astype(jnp.bfloat16), "bo2": p["bo2"].astype(jnp.float32),
        "g2": p["g2"].astype(jnp.float32), "b2": p["b2"].astype(jnp.float32),
    }


def _per_seq_vmem_bytes(S, H, ffn_chunk):
    f32 = 4
    return (S * 3 * H * f32            # fused qkv activations
            + 3 * S * S * f32          # one head's logits / exp / probs
            + 3 * S * H * f32          # ctx / attn_out / ffn accumulator
            + 2 * S * ffn_chunk * f32  # GELU chunk slab (+ temporaries)
            + 6 * S * H * f32)         # double-buffered x / out blocks + misc


def transformer_layer(x, add_mask, prepped, num_heads,
                      max_batch_block=8, max_ffn_chunk=1024):
    """x: (B, S, H); add_mask: (B, S) additive mask (0 = attend, -1e9 = masked)."""
    B, S, H = x.shape
    mask3 = add_mask.reshape(B, 1, S).astype(jnp.float32)
    weights = [prepped[n] for n in _PREPPED_ORDER]

    i_dim = prepped["wi"].shape[1]
    ffn_chunk = i_dim if i_dim <= max_ffn_chunk else _largest_divisor_leq(i_dim, max_ffn_chunk)

    # VMEM-budgeted batch block: largest bblk that (a) fits next to the
    # (double-buffered) weights within the per-generation VMEM budget and (b) leaves
    # >= 2 grid steps so both v7x TensorCores get work.
    budget = _vmem_capacity_bytes()
    weight_bytes = 2 * sum(int(w.size) * w.dtype.itemsize for w in weights)
    per_seq = _per_seq_vmem_bytes(S, H, ffn_chunk)
    cap = max(1, min(max_batch_block, B))
    while cap > 1 and weight_bytes + cap * per_seq > 0.8 * budget:
        cap -= 1
    bblk = _largest_divisor_leq(B, cap)
    if B // bblk < 2 and B > 1:
        bblk = _largest_divisor_leq(B, max(1, bblk // 2))
    grid = (B // bblk,)

    in_specs = [
        pl.BlockSpec((bblk, S, H), lambda b: (b, 0, 0)),
        pl.BlockSpec((bblk, 1, S), lambda b: (b, 0, 0)),
    ]
    # Weights: whole-array blocks, constant index maps -> no re-DMA across steps.
    # TODO(synk): additionally mark these pipeline_mode=pl.Buffered(1) on v7x at
    # production H=768/I=3072 to drop the second weight buffer.
    for w in weights:
        in_specs.append(pl.BlockSpec(w.shape, lambda b, nd=w.ndim: (0,) * nd))

    vmem_limit = max(32 << 20, int(0.85 * budget))

    return pl.pallas_call(
        functools.partial(transformer_layer_kernel, num_heads=num_heads,
                          ffn_chunk=ffn_chunk),
        out_shape=jax.ShapeDtypeStruct((B, S, H), x.dtype),
        grid_spec=pltpu.PrefetchScalarGridSpec(
            num_scalar_prefetch=0,
            grid=grid,
            in_specs=in_specs,
            out_specs=pl.BlockSpec((bblk, S, H), lambda b: (b, 0, 0)),
        ),
        compiler_params=pltpu.CompilerParams(
            dimension_semantics=("parallel",),
            vmem_limit_bytes=vmem_limit),
    )(x, mask3, *weights)


def netfound_layer(hidden_states, attention_mask, prepped_params, num_bursts,
                   max_burst_length, num_heads):
    """hidden_states: (B, num_bursts*L, H); attention_mask: (B, 1, 1, num_bursts*L) additive."""
    B, T, H = hidden_states.shape
    L = max_burst_length
    NB = num_bursts

    # transform_tokens2bursts / transform_masks2bursts (pure reshapes)
    burst_inputs = hidden_states.reshape(B * NB, L, H)
    burst_masks = attention_mask.reshape(B * NB, L)

    burst_out = transformer_layer(burst_inputs, burst_masks,
                                  prepped_params["burst"], num_heads)

    # transform_bursts2tokens
    outputs = burst_out.reshape(B, T, H)

    # Global (first) token of every burst via a contiguous slice of the (B, NB, L, H)
    # view (no strided ::L gather).
    burst_global_tokens = outputs.reshape(B, NB, L, H)[:, :, 0, :]      # (B, NB, H)
    burst_attention_mask = attention_mask.reshape(B, NB, L)[:, :, 0]    # (B, NB)

    # NOTE: the PyTorch forward adds position_embeddings(burst_positions) onto
    # outputs[:, ::L] here, but the flow encoder consumes the pre-add clone and those
    # rows are overwritten by flow_outputs below, so the add is dead w.r.t. every
    # returned tensor and is dropped.

    flow_out = transformer_layer(burst_global_tokens, burst_attention_mask,
                                 prepped_params["flow"], num_heads)

    # TODO(synk): fold this scatter into the flow-encoder pallas_call via an aliased
    # output BlockSpec (input_output_aliases) to avoid the extra (B, T, H) HBM pass.
    outputs = (outputs.reshape(B, NB, L, H)
               .at[:, :, 0, :].set(flow_out)
               .reshape(B, T, H))
    return outputs, burst_out, flow_out


# --------------------------- parameter init + reference ---------------------------

def init_layer_params(key, H, I):
    ks = jax.random.split(key, 16)

    def w(k, shape):
        return 0.02 * jax.random.normal(k, shape, jnp.float32)

    return {
        "wq": w(ks[0], (H, H)), "bq": w(ks[1], (1, H)),
        "wk": w(ks[2], (H, H)), "bk": w(ks[3], (1, H)),
        "wv": w(ks[4], (H, H)), "bv": w(ks[5], (1, H)),
        "wo": w(ks[6], (H, H)), "bo": w(ks[7], (1, H)),
        "g1": 1.0 + w(ks[8], (1, H)), "b1": w(ks[9], (1, H)),
        "wi": w(ks[10], (H, I)), "bi": w(ks[11], (1, I)),
        "wo2": w(ks[12], (I, H)), "bo2": w(ks[13], (1, H)),
        "g2": 1.0 + w(ks[14], (1, H)), "b2": w(ks[15], (1, H)),
    }


def ref_transformer_layer(x, add_mask, p, nh):
    B, S, H = x.shape
    dh = H // nh
    q = (x @ p["wq"] + p["bq"]).reshape(B, S, nh, dh)
    k = (x @ p["wk"] + p["bk"]).reshape(B, S, nh, dh)
    v = (x @ p["wv"] + p["bv"]).reshape(B, S, nh, dh)
    s = jnp.einsum("bqhd,bkhd->bhqk", q, k) / math.sqrt(dh)
    s = s + add_mask.reshape(B, 1, 1, S)
    attn_p = jax.nn.softmax(s, axis=-1)
    ctx = jnp.einsum("bhqk,bkhd->bqhd", attn_p, v).reshape(B, S, H)
    attn = _layer_norm(ctx @ p["wo"] + p["bo"] + x, p["g1"], p["b1"])
    ff = _gelu_tanh(attn @ p["wi"] + p["bi"])
    return _layer_norm(ff @ p["wo2"] + p["bo2"] + attn, p["g2"], p["b2"])


if __name__ == "__main__":
    B, NB, L, H, NH, I = 2, 4, 8, 32, 4, 64   # batch, max_bursts, max_burst_length, hidden, heads, ffn
    T = NB * L

    key = jax.random.PRNGKey(0)
    k_x, k_m, k_b, k_f, k_p = jax.random.split(key, 5)

    hidden_states = jax.random.normal(k_x, (B, T, H), jnp.float32)

    # binary validity mask -> HF "extended" additive mask (0 attend / -1e9 masked)
    binary = (jax.random.uniform(k_m, (B, T)) > 0.2).astype(jnp.float32)
    binary = binary.at[:, ::L].set(1.0)          # global (CLS-like) token of each burst is valid
    attention_mask = ((1.0 - binary) * -1e9).reshape(B, 1, 1, T)

    params = {
        "burst": init_layer_params(k_b, H, I),
        "flow": init_layer_params(k_f, H, I),
        "pos_emb": (0.02 * jax.random.normal(k_p, (NB + 1, H), jnp.float32)).at[0].set(0.0),
    }

    # one-time parameter preparation (fused+scaled QKV, bf16 matmul weights)
    prepped = {"burst": prepare_layer_params(params["burst"], NH),
               "flow": prepare_layer_params(params["flow"], NH)}

    outputs, burst_out, flow_out = netfound_layer(
        hidden_states, attention_mask, prepped, NB, L, NH)
    jax.block_until_ready((outputs, burst_out, flow_out))

    # pure-JAX f32 reference (same semantics as the PyTorch forward)
    ref_burst = ref_transformer_layer(hidden_states.reshape(B * NB, L, H),
                                      attention_mask.reshape(B * NB, L),
                                      params["burst"], NH)
    ref_outputs = ref_burst.reshape(B, T, H)
    ref_flow = ref_transformer_layer(ref_outputs[:, ::L],
                                     attention_mask[:, :, :, ::L].reshape(B, NB),
                                     params["flow"], NH)
    ref_outputs = ref_outputs.at[:, ::L].set(ref_flow)

    max_err = float(jnp.max(jnp.abs(outputs - ref_outputs)))
    # tolerance vs the f32 reference is set for bf16 MXU operands (f32 accumulation,
    # f32 layer-norm/softmax stats) plus the EUP approximate reciprocal
    assert jnp.allclose(outputs, ref_outputs, atol=2e-2, rtol=2e-2), max_err
    assert outputs.shape == (B, T, H)
    assert burst_out.shape == (B * NB, L, H)
    assert flow_out.shape == (B, NB, H)
    print("KERNEL_OK")
</pallas_src>

<mosaic_0001>
module attributes {stable_mosaic.version = 11 : i64} {
  func.func @transformer_layer_kernel(%arg0: i32, %arg1: memref<4x8x32xf32, #tpu.memory_space<vmem>>, %arg2: memref<4x1x8xf32, #tpu.memory_space<vmem>>, %arg3: memref<32x96xbf16, #tpu.memory_space<vmem>>, %arg4: memref<1x96xf32, #tpu.memory_space<vmem>>, %arg5: memref<32x32xbf16, #tpu.memory_space<vmem>>, %arg6: memref<1x32xf32, #tpu.memory_space<vmem>>, %arg7: memref<1x32xf32, #tpu.memory_space<vmem>>, %arg8: memref<1x32xf32, #tpu.memory_space<vmem>>, %arg9: memref<32x64xbf16, #tpu.memory_space<vmem>>, %arg10: memref<1x64xf32, #tpu.memory_space<vmem>>, %arg11: memref<64x32xbf16, #tpu.memory_space<vmem>>, %arg12: memref<1x32xf32, #tpu.memory_space<vmem>>, %arg13: memref<1x32xf32, #tpu.memory_space<vmem>>, %arg14: memref<1x32xf32, #tpu.memory_space<vmem>>, %arg15: memref<4x8x32xf32, #tpu.memory_space<vmem>>) attributes {dimension_semantics = [#tpu.dimension_semantics<parallel>], iteration_bounds = array<i64: 2>, scalar_prefetch = 0 : i64, scratch_operands = 0 : i64, tpu.core_type = #tpu.core_type<tc>, window_params = [{transform_indices = @transform_0, window_bounds = array<i64: 4, 8, 32>}, {transform_indices = @transform_1, window_bounds = array<i64: 4, 1, 8>}, {pipeline_mode = #tpu.pipeline_mode<synchronous>, transform_indices = @transform_2, window_bounds = array<i64: 32, 96>}, {pipeline_mode = #tpu.pipeline_mode<synchronous>, transform_indices = @transform_3, window_bounds = array<i64: 1, 96>}, {pipeline_mode = #tpu.pipeline_mode<synchronous>, transform_indices = @transform_4, window_bounds = array<i64: 32, 32>}, {pipeline_mode = #tpu.pipeline_mode<synchronous>, transform_indices = @transform_5, window_bounds = array<i64: 1, 32>}, {pipeline_mode = #tpu.pipeline_mode<synchronous>, transform_indices = @transform_6, window_bounds = array<i64: 1, 32>}, {pipeline_mode = #tpu.pipeline_mode<synchronous>, transform_indices = @transform_7, window_bounds = array<i64: 1, 32>}, {pipeline_mode = #tpu.pipeline_mode<synchronous>, transform_indices = @transform_8, window_bounds = array<i64: 32, 64>}, {pipeline_mode = #tpu.pipeline_mode<synchronous>, transform_indices = @transform_9, window_bounds = array<i64: 1, 64>}, {pipeline_mode = #tpu.pipeline_mode<synchronous>, transform_indices = @transform_10, window_bounds = array<i64: 64, 32>}, {pipeline_mode = #tpu.pipeline_mode<synchronous>, transform_indices = @transform_11, window_bounds = array<i64: 1, 32>}, {pipeline_mode = #tpu.pipeline_mode<synchronous>, transform_indices = @transform_12, window_bounds = array<i64: 1, 32>}, {pipeline_mode = #tpu.pipeline_mode<synchronous>, transform_indices = @transform_13, window_bounds = array<i64: 1, 32>}, {transform_indices = @transform_14, window_bounds = array<i64: 4, 8, 32>}]} {
    %c0 = arith.constant 0 : index
    %c0_0 = arith.constant 0 : index
    %c0_1 = arith.constant 0 : index
    %0 = vector.load %arg1[%c0, %c0_0, %c0_1] : memref<4x8x32xf32, #tpu.memory_space<vmem>>, vector<4x8x32xf32>
    %1 = vector.shape_cast %0 : vector<4x8x32xf32> to vector<32x32xf32>
    %2 = arith.truncf %1 : vector<32x32xf32> to vector<32x32xbf16>
    %c0_2 = arith.constant 0 : index
    %c0_3 = arith.constant 0 : index
    %c0_4 = arith.constant 0 : index
    %3 = vector.load %arg2[%c0_2, %c0_3, %c0_4] : memref<4x1x8xf32, #tpu.memory_space<vmem>>, vector<4x1x8xf32>
    %4 = vector.shape_cast %3 : vector<4x1x8xf32> to vector<4x1x8xf32>
    %5 = vector.broadcast %4 : vector<4x1x8xf32> to vector<4x8x8xf32>
    %c0_5 = arith.constant 0 : index
    %c0_6 = arith.constant 0 : index
    %6 = vector.load %arg3[%c0_5, %c0_6] : memref<32x96xbf16, #tpu.memory_space<vmem>>, vector<32x96xbf16>
    %cst = arith.constant dense<0.000000e+00> : vector<32x96xf32>
    %7 = tpu.matmul %2, %6, %cst {dimension_numbers = #tpu.dot_dimension_numbers<[1], [0], [0], [1], [0, 0, 1, 1], [], []>} : vector<32x32xbf16>, vector<32x96xbf16>, vector<32x96xf32> -> vector<32x96xf32>
    %c0_7 = arith.constant 0 : index
    %c0_8 = arith.constant 0 : index
    %8 = vector.load %arg4[%c0_7, %c0_8] : memref<1x96xf32, #tpu.memory_space<vmem>>, vector<1x96xf32>
    %9 = vector.broadcast %8 : vector<1x96xf32> to vector<32x96xf32>
    %10 = arith.addf %7, %9 : vector<32x96xf32>
    %11 = vector.shape_cast %10 : vector<32x96xf32> to vector<4x8x96xf32>
    %12 = vector.extract_strided_slice %11 {offsets = [0, 0, 0], sizes = [4, 8, 8], strides = [1, 1, 1]} : vector<4x8x96xf32> to vector<4x8x8xf32>
    %13 = arith.truncf %12 : vector<4x8x8xf32> to vector<4x8x8xbf16>
    %14 = vector.extract_strided_slice %11 {offsets = [0, 0, 32], sizes = [4, 8, 8], strides = [1, 1, 1]} : vector<4x8x96xf32> to vector<4x8x8xf32>
    %15 = arith.truncf %14 : vector<4x8x8xf32> to vector<4x8x8xbf16>
    %16 = vector.extract_strided_slice %11 {offsets = [0, 0, 64], sizes = [4, 8, 8], strides = [1, 1, 1]} : vector<4x8x96xf32> to vector<4x8x8xf32>
    %17 = arith.truncf %16 : vector<4x8x8xf32> to vector<4x8x8xbf16>
    "tpu.trace_start"() <{level = 10 : i32, message = "bqd,bkd->bqk"}> : () -> ()
    %cst_9 = arith.constant dense<0.000000e+00> : vector<4x8x8xf32>
    %18 = tpu.matmul %13, %15, %cst_9 {dimension_numbers = #tpu.dot_dimension_numbers<[2], [2], [1], [1], [0, 0, 0, 1, 1, 1], [0], [0]>} : vector<4x8x8xbf16>, vector<4x8x8xbf16>, vector<4x8x8xf32> -> vector<4x8x8xf32>
    "tpu.trace_stop"() : () -> ()
    %19 = arith.addf %18, %5 : vector<4x8x8xf32>
    %cst_10 = arith.constant dense<0xFF800000> : vector<4x8xf32>
    %20 = vector.multi_reduction <maximumf>, %19, %cst_10 [2] : vector<4x8x8xf32> to vector<4x8xf32>
    %21 = vector.shape_cast %20 : vector<4x8xf32> to vector<4x8x1xf32>
    %22 = vector.broadcast %21 : vector<4x8x1xf32> to vector<4x8x8xf32>
    %23 = arith.subf %19, %22 : vector<4x8x8xf32>
    %24 = math.exp %23 : vector<4x8x8xf32>
    %cst_11 = arith.constant dense<0.000000e+00> : vector<4x8xf32>
    %25 = vector.multi_reduction <add>, %24, %cst_11 [2] : vector<4x8x8xf32> to vector<4x8xf32>
    %26 = vector.shape_cast %25 : vector<4x8xf32> to vector<4x8x1xf32>
    %27 = tpu.reciprocal %26 {approx = true} : vector<4x8x1xf32> -> vector<4x8x1xf32>
    %28 = vector.broadcast %27 : vector<4x8x1xf32> to vector<4x8x8xf32>
    %29 = arith.mulf %24, %28 : vector<4x8x8xf32>
    %30 = arith.truncf %29 : vector<4x8x8xf32> to vector<4x8x8xbf16>
    "tpu.trace_start"() <{level = 10 : i32, message = "bqk,bkd->bqd"}> : () -> ()
    %cst_12 = arith.constant dense<0.000000e+00> : vector<4x8x8xf32>
    %31 = tpu.matmul %30, %17, %cst_12 {dimension_numbers = #tpu.dot_dimension_numbers<[2], [1], [1], [2], [0, 0, 0, 1, 1, 2], [0], [0]>} : vector<4x8x8xbf16>, vector<4x8x8xbf16>, vector<4x8x8xf32> -> vector<4x8x8xf32>
    "tpu.trace_stop"() : () -> ()
    %32 = vector.extract_strided_slice %11 {offsets = [0, 0, 8], sizes = [4, 8, 8], strides = [1, 1, 1]} : vector<4x8x96xf32> to vector<4x8x8xf32>
    %33 = arith.truncf %32 : vector<4x8x8xf32> to vector<4x8x8xbf16>
    %34 = vector.extract_strided_slice %11 {offsets = [0, 0, 40], sizes = [4, 8, 8], strides = [1, 1, 1]} : vector<4x8x96xf32> to vector<4x8x8xf32>
    %35 = arith.truncf %34 : vector<4x8x8xf32> to vector<4x8x8xbf16>
    %36 = vector.extract_strided_slice %11 {offsets = [0, 0, 72], sizes = [4, 8, 8], strides = [1, 1, 1]} : vector<4x8x96xf32> to vector<4x8x8xf32>
    %37 = arith.truncf %36 : vector<4x8x8xf32> to vector<4x8x8xbf16>
    "tpu.trace_start"() <{level = 10 : i32, message = "bqd,bkd->bqk"}> : () -> ()
    %cst_13 = arith.constant dense<0.000000e+00> : vector<4x8x8xf32>
    %38 = tpu.matmul %33, %35, %cst_13 {dimension_numbers = #tpu.dot_dimension_numbers<[2], [2], [1], [1], [0, 0, 0, 1, 1, 1], [0], [0]>} : vector<4x8x8xbf16>, vector<4x8x8xbf16>, vector<4x8x8xf32> -> vector<4x8x8xf32>
    "tpu.trace_stop"() : () -> ()
    %39 = arith.addf %38, %5 : vector<4x8x8xf32>
    %cst_14 = arith.constant dense<0xFF800000> : vector<4x8xf32>
    %40 = vector.multi_reduction <maximumf>, %39, %cst_14 [2] : vector<4x8x8xf32> to vector<4x8xf32>
    %41 = vector.shape_cast %40 : vector<4x8xf32> to vector<4x8x1xf32>
    %42 = vector.broadcast %41 : vector<4x8x1xf32> to vector<4x8x8xf32>
    %43 = arith.subf %39, %42 : vector<4x8x8xf32>
    %44 = math.exp %43 : vector<4x8x8xf32>
    %cst_15 = arith.constant dense<0.000000e+00> : vector<4x8xf32>
    %45 = vector.multi_reduction <add>, %44, %cst_15 [2] : vector<4x8x8xf32> to vector<4x8xf32>
    %46 = vector.shape_cast %45 : vector<4x8xf32> to vector<4x8x1xf32>
    %47 = tpu.reciprocal %46 {approx = true} : vector<4x8x1xf32> -> vector<4x8x1xf32>
    %48 = vector.broadcast %47 : vector<4x8x1xf32> to vector<4x8x8xf32>
    %49 = arith.mulf %44, %48 : vector<4x8x8xf32>
    %50 = arith.truncf %49 : vector<4x8x8xf32> to vector<4x8x8xbf16>
    "tpu.trace_start"() <{level = 10 : i32, message = "bqk,bkd->bqd"}> : () -> ()
    %cst_16 = arith.constant dense<0.000000e+00> : vector<4x8x8xf32>
    %51 = tpu.matmul %50, %37, %cst_16 {dimension_numbers = #tpu.dot_dimension_numbers<[2], [1], [1], [2], [0, 0, 0, 1, 1, 2], [0], [0]>} : vector<4x8x8xbf16>, vector<4x8x8xbf16>, vector<4x8x8xf32> -> vector<4x8x8xf32>
    "tpu.trace_stop"() : () -> ()
    %52 = vector.extract_strided_slice %11 {offsets = [0, 0, 16], sizes = [4, 8, 8], strides = [1, 1, 1]} : vector<4x8x96xf32> to vector<4x8x8xf32>
    %53 = arith.truncf %52 : vector<4x8x8xf32> to vector<4x8x8xbf16>
    %54 = vector.extract_strided_slice %11 {offsets = [0, 0, 48], sizes = [4, 8, 8], strides = [1, 1, 1]} : vector<4x8x96xf32> to vector<4x8x8xf32>
    %55 = arith.truncf %54 : vector<4x8x8xf32> to vector<4x8x8xbf16>
    %56 = vector.extract_strided_slice %11 {offsets = [0, 0, 80], sizes = [4, 8, 8], strides = [1, 1, 1]} : vector<4x8x96xf32> to vector<4x8x8xf32>
    %57 = arith.truncf %56 : vector<4x8x8xf32> to vector<4x8x8xbf16>
    "tpu.trace_start"() <{level = 10 : i32, message = "bqd,bkd->bqk"}> : () -> ()
    %cst_17 = arith.constant dense<0.000000e+00> : vector<4x8x8xf32>
    %58 = tpu.matmul %53, %55, %cst_17 {dimension_numbers = #tpu.dot_dimension_numbers<[2], [2], [1], [1], [0, 0, 0, 1, 1, 1], [0], [0]>} : vector<4x8x8xbf16>, vector<4x8x8xbf16>, vector<4x8x8xf32> -> vector<4x8x8xf32>
    "tpu.trace_stop"() : () -> ()
    %59 = arith.addf %58, %5 : vector<4x8x8xf32>
    %cst_18 = arith.constant dense<0xFF800000> : vector<4x8xf32>
    %60 = vector.multi_reduction <maximumf>, %59, %cst_18 [2] : vector<4x8x8xf32> to vector<4x8xf32>
    %61 = vector.shape_cast %60 : vector<4x8xf32> to vector<4x8x1xf32>
    %62 = vector.broadcast %61 : vector<4x8x1xf32> to vector<4x8x8xf32>
    %63 = arith.subf %59, %62 : vector<4x8x8xf32>
    %64 = math.exp %63 : vector<4x8x8xf32>
    %cst_19 = arith.constant dense<0.000000e+00> : vector<4x8xf32>
    %65 = vector.multi_reduction <add>, %64, %cst_19 [2] : vector<4x8x8xf32> to vector<4x8xf32>
    %66 = vector.shape_cast %65 : vector<4x8xf32> to vector<4x8x1xf32>
    %67 = tpu.reciprocal %66 {approx = true} : vector<4x8x1xf32> -> vector<4x8x1xf32>
    %68 = vector.broadcast %67 : vector<4x8x1xf32> to vector<4x8x8xf32>
    %69 = arith.mulf %64, %68 : vector<4x8x8xf32>
    %70 = arith.truncf %69 : vector<4x8x8xf32> to vector<4x8x8xbf16>
    "tpu.trace_start"() <{level = 10 : i32, message = "bqk,bkd->bqd"}> : () -> ()
    %cst_20 = arith.constant dense<0.000000e+00> : vector<4x8x8xf32>
    %71 = tpu.matmul %70, %57, %cst_20 {dimension_numbers = #tpu.dot_dimension_numbers<[2], [1], [1], [2], [0, 0, 0, 1, 1, 2], [0], [0]>} : vector<4x8x8xbf16>, vector<4x8x8xbf16>, vector<4x8x8xf32> -> vector<4x8x8xf32>
    "tpu.trace_stop"() : () -> ()
    %72 = vector.extract_strided_slice %11 {offsets = [0, 0, 24], sizes = [4, 8, 8], strides = [1, 1, 1]} : vector<4x8x96xf32> to vector<4x8x8xf32>
    %73 = arith.truncf %72 : vector<4x8x8xf32> to vector<4x8x8xbf16>
    %74 = vector.extract_strided_slice %11 {offsets = [0, 0, 56], sizes = [4, 8, 8], strides = [1, 1, 1]} : vector<4x8x96xf32> to vector<4x8x8xf32>
    %75 = arith.truncf %74 : vector<4x8x8xf32> to vector<4x8x8xbf16>
    %76 = vector.extract_strided_slice %11 {offsets = [0, 0, 88], sizes = [4, 8, 8], strides = [1, 1, 1]} : vector<4x8x96xf32> to vector<4x8x8xf32>
    %77 = arith.truncf %76 : vector<4x8x8xf32> to vector<4x8x8xbf16>
    "tpu.trace_start"() <{level = 10 : i32, message = "bqd,bkd->bqk"}> : () -> ()
    %cst_21 = arith.constant dense<0.000000e+00> : vector<4x8x8xf32>
    %78 = tpu.matmul %73, %75, %cst_21 {dimension_numbers = #tpu.dot_dimension_numbers<[2], [2], [1], [1], [0, 0, 0, 1, 1, 1], [0], [0]>} : vector<4x8x8xbf16>, vector<4x8x8xbf16>, vector<4x8x8xf32> -> vector<4x8x8xf32>
    "tpu.trace_stop"() : () -> ()
    %79 = arith.addf %78, %5 : vector<4x8x8xf32>
    %cst_22 = arith.constant dense<0xFF800000> : vector<4x8xf32>
    %80 = vector.multi_reduction <maximumf>, %79, %cst_22 [2] : vector<4x8x8xf32> to vector<4x8xf32>
    %81 = vector.shape_cast %80 : vector<4x8xf32> to vector<4x8x1xf32>
    %82 = vector.broadcast %81 : vector<4x8x1xf32> to vector<4x8x8xf32>
    %83 = arith.subf %79, %82 : vector<4x8x8xf32>
    %84 = math.exp %83 : vector<4x8x8xf32>
    %cst_23 = arith.constant dense<0.000000e+00> : vector<4x8xf32>
    %85 = vector.multi_reduction <add>, %84, %cst_23 [2] : vector<4x8x8xf32> to vector<4x8xf32>
    %86 = vector.shape_cast %85 : vector<4x8xf32> to vector<4x8x1xf32>
    %87 = tpu.reciprocal %86 {approx = true} : vector<4x8x1xf32> -> vector<4x8x1xf32>
    %88 = vector.broadcast %87 : vector<4x8x1xf32> to vector<4x8x8xf32>
    %89 = arith.mulf %84, %88 : vector<4x8x8xf32>
    %90 = arith.truncf %89 : vector<4x8x8xf32> to vector<4x8x8xbf16>
    "tpu.trace_start"() <{level = 10 : i32, message = "bqk,bkd->bqd"}> : () -> ()
    %cst_24 = arith.constant dense<0.000000e+00> : vector<4x8x8xf32>
    %91 = tpu.matmul %90, %77, %cst_24 {dimension_numbers = #tpu.dot_dimension_numbers<[2], [1], [1], [2], [0, 0, 0, 1, 1, 2], [0], [0]>} : vector<4x8x8xbf16>, vector<4x8x8xbf16>, vector<4x8x8xf32> -> vector<4x8x8xf32>
    "tpu.trace_stop"() : () -> ()
    %92 = tpu.concatenate %31, %51, %71, %91 in 2 : vector<4x8x8xf32>, vector<4x8x8xf32>, vector<4x8x8xf32>, vector<4x8x8xf32> -> vector<4x8x32xf32>
    %93 = vector.shape_cast %92 : vector<4x8x32xf32> to vector<32x32xf32>
    %94 = arith.truncf %93 : vector<32x32xf32> to vector<32x32xbf16>
    %c0_25 = arith.constant 0 : index
    %c0_26 = arith.constant 0 : index
    %95 = vector.load %arg5[%c0_25, %c0_26] : memref<32x32xbf16, #tpu.memory_space<vmem>>, vector<32x32xbf16>
    %cst_27 = arith.constant dense<0.000000e+00> : vector<32x32xf32>
    %96 = tpu.matmul %94, %95, %cst_27 {dimension_numbers = #tpu.dot_dimension_numbers<[1], [0], [0], [1], [0, 0, 1, 1], [], []>} : vector<32x32xbf16>, vector<32x32xbf16>, vector<32x32xf32> -> vector<32x32xf32>
    %c0_28 = arith.constant 0 : index
    %c0_29 = arith.constant 0 : index
    %97 = vector.load %arg6[%c0_28, %c0_29] : memref<1x32xf32, #tpu.memory_space<vmem>>, vector<1x32xf32>
    %98 = vector.broadcast %97 : vector<1x32xf32> to vector<32x32xf32>
    %99 = arith.addf %96, %98 : vector<32x32xf32>
    %100 = arith.addf %99, %1 : vector<32x32xf32>
    %c0_30 = arith.constant 0 : index
    %c0_31 = arith.constant 0 : index
    %101 = vector.load %arg7[%c0_30, %c0_31] : memref<1x32xf32, #tpu.memory_space<vmem>>, vector<1x32xf32>
    %c0_32 = arith.constant 0 : index
    %c0_33 = arith.constant 0 : index
    %102 = vector.load %arg8[%c0_32, %c0_33] : memref<1x32xf32, #tpu.memory_space<vmem>>, vector<1x32xf32>
    %cst_34 = arith.constant dense<0.000000e+00> : vector<32xf32>
    %103 = vector.multi_reduction <add>, %100, %cst_34 [1] : vector<32x32xf32> to vector<32xf32>
    %104 = vector.shape_cast %103 : vector<32xf32> to vector<32x1xf32>
    %cst_35 = arith.constant 3.200000e+01 : f32
    %105 = vector.broadcast %cst_35 : f32 to vector<32x1xf32>
    %106 = arith.divf %104, %105 : vector<32x1xf32>
    %107 = vector.broadcast %106 : vector<32x1xf32> to vector<32x32xf32>
    %108 = arith.subf %100, %107 : vector<32x32xf32>
    %109 = arith.mulf %108, %108 : vector<32x32xf32>
    %cst_36 = arith.constant dense<0.000000e+00> : vector<32xf32>
    %110 = vector.multi_reduction <add>, %109, %cst_36 [1] : vector<32x32xf32> to vector<32xf32>
    %111 = vector.shape_cast %110 : vector<32xf32> to vector<32x1xf32>
    %cst_37 = arith.constant 3.200000e+01 : f32
    %112 = vector.broadcast %cst_37 : f32 to vector<32x1xf32>
    %113 = arith.divf %111, %112 : vector<32x1xf32>
    %114 = vector.broadcast %106 : vector<32x1xf32> to vector<32x32xf32>
    %115 = arith.subf %100, %114 : vector<32x32xf32>
    %cst_38 = arith.constant 9.99999996E-13 : f32
    %116 = vector.broadcast %cst_38 : f32 to vector<32x1xf32>
    %117 = arith.addf %113, %116 : vector<32x1xf32>
    %118 = math.rsqrt %117 : vector<32x1xf32>
    %119 = vector.broadcast %118 : vector<32x1xf32> to vector<32x32xf32>
    %120 = arith.mulf %115, %119 : vector<32x32xf32>
    %121 = vector.broadcast %101 : vector<1x32xf32> to vector<32x32xf32>
    %122 = arith.mulf %120, %121 : vector<32x32xf32>
    %123 = vector.broadcast %102 : vector<1x32xf32> to vector<32x32xf32>
    %124 = arith.addf %122, %123 : vector<32x32xf32>
    %125 = arith.truncf %124 : vector<32x32xf32> to vector<32x32xbf16>
    %cst_39 = arith.constant 0.000000e+00 : f32
    %126 = vector.broadcast %cst_39 : f32 to vector<32x32xf32>
    %c0_40 = arith.constant 0 : index
    %c0_41 = arith.constant 0 : index
    %127 = vector.load %arg9[%c0_40, %c0_41] : memref<32x64xbf16, #tpu.memory_space<vmem>>, vector<32x64xbf16>
    %cst_42 = arith.constant dense<0.000000e+00> : vector<32x64xf32>
    %128 = tpu.matmul %125, %127, %cst_42 {dimension_numbers = #tpu.dot_dimension_numbers<[1], [0], [0], [1], [0, 0, 1, 1], [], []>} : vector<32x32xbf16>, vector<32x64xbf16>, vector<32x64xf32> -> vector<32x64xf32>
    %c0_43 = arith.constant 0 : index
    %c0_44 = arith.constant 0 : index
    %129 = vector.load %arg10[%c0_43, %c0_44] : memref<1x64xf32, #tpu.memory_space<vmem>>, vector<1x64xf32>
    %130 = vector.broadcast %129 : vector<1x64xf32> to vector<32x64xf32>
    %131 = arith.addf %128, %130 : vector<32x64xf32>
    %cst_45 = arith.constant 5.000000e-01 : f32
    %132 = vector.broadcast %cst_45 : f32 to vector<32x64xf32>
    %133 = arith.mulf %132, %131 : vector<32x64xf32>
    %cst_46 = arith.constant 4.471500e-02 : f32
    %134 = vector.broadcast %cst_46 : f32 to vector<32x64xf32>
    %135 = arith.mulf %134, %131 : vector<32x64xf32>
    %136 = arith.mulf %135, %131 : vector<32x64xf32>
    %137 = arith.mulf %136, %131 : vector<32x64xf32>
    %138 = arith.addf %131, %137 : vector<32x64xf32>
    %cst_47 = arith.constant 0.797884583 : f32
    %139 = vector.broadcast %cst_47 : f32 to vector<32x64xf32>
    %140 = arith.mulf %139, %138 : vector<32x64xf32>
    %141 = math.tanh %140 : vector<32x64xf32>
    %cst_48 = arith.constant 1.000000e+00 : f32
    %142 = vector.broadcast %cst_48 : f32 to vector<32x64xf32>
    %143 = arith.addf %142, %141 : vector<32x64xf32>
    %144 = arith.mulf %133, %143 : vector<32x64xf32>
    %145 = arith.truncf %144 : vector<32x64xf32> to vector<32x64xbf16>
    %c0_49 = arith.constant 0 : index
    %c0_50 = arith.constant 0 : index
    %146 = vector.load %arg11[%c0_49, %c0_50] : memref<64x32xbf16, #tpu.memory_space<vmem>>, vector<64x32xbf16>
    %cst_51 = arith.constant dense<0.000000e+00> : vector<32x32xf32>
    %147 = tpu.matmul %145, %146, %cst_51 {dimension_numbers = #tpu.dot_dimension_numbers<[1], [0], [0], [1], [0, 0, 1, 1], [], []>} : vector<32x64xbf16>, vector<64x32xbf16>, vector<32x32xf32> -> vector<32x32xf32>
    %148 = arith.addf %126, %147 : vector<32x32xf32>
    %c0_52 = arith.constant 0 : index
    %c0_53 = arith.constant 0 : index
    %149 = vector.load %arg12[%c0_52, %c0_53] : memref<1x32xf32, #tpu.memory_space<vmem>>, vector<1x32xf32>
    %150 = vector.broadcast %149 : vector<1x32xf32> to vector<32x32xf32>
    %151 = arith.addf %148, %150 : vector<32x32xf32>
    %152 = arith.addf %151, %124 : vector<32x32xf32>
    %c0_54 = arith.constant 0 : index
    %c0_55 = arith.constant 0 : index
    %153 = vector.load %arg13[%c0_54, %c0_55] : memref<1x32xf32, #tpu.memory_space<vmem>>, vector<1x32xf32>
    %c0_56 = arith.constant 0 : index
    %c0_57 = arith.constant 0 : index
    %154 = vector.load %arg14[%c0_56, %c0_57] : memref<1x32xf32, #tpu.memory_space<vmem>>, vector<1x32xf32>
    %cst_58 = arith.constant dense<0.000000e+00> : vector<32xf32>
    %155 = vector.multi_reduction <add>, %152, %cst_58 [1] : vector<32x32xf32> to vector<32xf32>
    %156 = vector.shape_cast %155 : vector<32xf32> to vector<32x1xf32>
    %cst_59 = arith.constant 3.200000e+01 : f32
    %157 = vector.broadcast %cst_59 : f32 to vector<32x1xf32>
    %158 = arith.divf %156, %157 : vector<32x1xf32>
    %159 = vector.broadcast %158 : vector<32x1xf32> to vector<32x32xf32>
    %160 = arith.subf %152, %159 : vector<32x32xf32>
    %161 = arith.mulf %160, %160 : vector<32x32xf32>
    %cst_60 = arith.constant dense<0.000000e+00> : vector<32xf32>
    %162 = vector.multi_reduction <add>, %161, %cst_60 [1] : vector<32x32xf32> to vector<32xf32>
    %163 = vector.shape_cast %162 : vector<32xf32> to vector<32x1xf32>
    %cst_61 = arith.constant 3.200000e+01 : f32
    %164 = vector.broadcast %cst_61 : f32 to vector<32x1xf32>
    %165 = arith.divf %163, %164 : vector<32x1xf32>
    %166 = vector.broadcast %158 : vector<32x1xf32> to vector<32x32xf32>
    %167 = arith.subf %152, %166 : vector<32x32xf32>
    %cst_62 = arith.constant 9.99999996E-13 : f32
    %168 = vector.broadcast %cst_62 : f32 to vector<32x1xf32>
    %169 = arith.addf %165, %168 : vector<32x1xf32>
    %170 = math.rsqrt %169 : vector<32x1xf32>
    %171 = vector.broadcast %170 : vector<32x1xf32> to vector<32x32xf32>
    %172 = arith.mulf %167, %171 : vector<32x32xf32>
    %173 = vector.broadcast %153 : vector<1x32xf32> to vector<32x32xf32>
    %174 = arith.mulf %172, %173 : vector<32x32xf32>
    %175 = vector.broadcast %154 : vector<1x32xf32> to vector<32x32xf32>
    %176 = arith.addf %174, %175 : vector<32x32xf32>
    %177 = vector.shape_cast %176 : vector<32x32xf32> to vector<4x8x32xf32>
    %c0_63 = arith.constant 0 : index
    %c0_64 = arith.constant 0 : index
    %c0_65 = arith.constant 0 : index
    %178 = vector.load %arg15[%c0_63, %c0_64, %c0_65] : memref<4x8x32xf32, #tpu.memory_space<vmem>>, vector<4x8x32xf32>
    tpu.vector_store %arg15[%c0_63, %c0_64, %c0_65], %177 {strides = array<i32>} : memref<4x8x32xf32, #tpu.memory_space<vmem>>, vector<4x8x32xf32>,
    return
  }
  func.func @transform_0(%arg0: i32) -> (i32, i32, i32) {
    %c0_i32 = arith.constant 0 : i32
    %c0_i32_0 = arith.constant 0 : i32
    %c0_i32_1 = arith.constant 0 : i32
    return %arg0, %c0_i32, %c0_i32_0 : i32, i32, i32
  }
  func.func @transform_1(%arg0: i32) -> (i32, i32, i32) {
    %c0_i32 = arith.constant 0 : i32
    %c0_i32_0 = arith.constant 0 : i32
    %c0_i32_1 = arith.constant 0 : i32
    return %arg0, %c0_i32, %c0_i32_0 : i32, i32, i32
  }
  func.func @transform_2(%arg0: i32) -> (i32, i32) {
    %c0_i32 = arith.constant 0 : i32
    %c0_i32_0 = arith.constant 0 : i32
    %c0_i32_1 = arith.constant 0 : i32
    return %c0_i32, %c0_i32_0 : i32, i32
  }
  func.func @transform_3(%arg0: i32) -> (i32, i32) {
    %c0_i32 = arith.constant 0 : i32
    %c0_i32_0 = arith.constant 0 : i32
    %c0_i32_1 = arith.constant 0 : i32
    return %c0_i32, %c0_i32_0 : i32, i32
  }
  func.func @transform_4(%arg0: i32) -> (i32, i32) {
    %c0_i32 = arith.constant 0 : i32
    %c0_i32_0 = arith.constant 0 : i32
    %c0_i32_1 = arith.constant 0 : i32
    return %c0_i32, %c0_i32_0 : i32, i32
  }
  func.func @transform_5(%arg0: i32) -> (i32, i32) {
    %c0_i32 = arith.constant 0 : i32
    %c0_i32_0 = arith.constant 0 : i32
    %c0_i32_1 = arith.constant 0 : i32
    return %c0_i32, %c0_i32_0 : i32, i32
  }
  func.func @transform_6(%arg0: i32) -> (i32, i32) {
    %c0_i32 = arith.constant 0 : i32
    %c0_i32_0 = arith.constant 0 : i32
    %c0_i32_1 = arith.constant 0 : i32
    return %c0_i32, %c0_i32_0 : i32, i32
  }
  func.func @transform_7(%arg0: i32) -> (i32, i32) {
    %c0_i32 = arith.constant 0 : i32
    %c0_i32_0 = arith.constant 0 : i32
    %c0_i32_1 = arith.constant 0 : i32
    return %c0_i32, %c0_i32_0 : i32, i32
  }
  func.func @transform_8(%arg0: i32) -> (i32, i32) {
    %c0_i32 = arith.constant 0 : i32
    %c0_i32_0 = arith.constant 0 : i32
    %c0_i32_1 = arith.constant 0 : i32
    return %c0_i32, %c0_i32_0 : i32, i32
  }
  func.func @transform_9(%arg0: i32) -> (i32, i32) {
    %c0_i32 = arith.constant 0 : i32
    %c0_i32_0 = arith.constant 0 : i32
    %c0_i32_1 = arith.constant 0 : i32
    return %c0_i32, %c0_i32_0 : i32, i32
  }
  func.func @transform_10(%arg0: i32) -> (i32, i32) {
    %c0_i32 = arith.constant 0 : i32
    %c0_i32_0 = arith.constant 0 : i32
    %c0_i32_1 = arith.constant 0 : i32
    return %c0_i32, %c0_i32_0 : i32, i32
  }
  func.func @transform_11(%arg0: i32) -> (i32, i32) {
    %c0_i32 = arith.constant 0 : i32
    %c0_i32_0 = arith.constant 0 : i32
    %c0_i32_1 = arith.constant 0 : i32
    return %c0_i32, %c0_i32_0 : i32, i32
  }
  func.func @transform_12(%arg0: i32) -> (i32, i32) {
    %c0_i32 = arith.constant 0 : i32
    %c0_i32_0 = arith.constant 0 : i32
    %c0_i32_1 = arith.constant 0 : i32
    return %c0_i32, %c0_i32_0 : i32, i32
  }
  func.func @transform_13(%arg0: i32) -> (i32, i32) {
    %c0_i32 = arith.constant 0 : i32
    %c0_i32_0 = arith.constant 0 : i32
    %c0_i32_1 = arith.constant 0 : i32
    return %c0_i32, %c0_i32_0 : i32, i32
  }
  func.func @transform_14(%arg0: i32) -> (i32, i32, i32) {
    %c0_i32 = arith.constant 0 : i32
    %c0_i32_0 = arith.constant 0 : i32
    %c0_i32_1 = arith.constant 0 : i32
    return %arg0, %c0_i32, %c0_i32_0 : i32, i32, i32
  }
}

</mosaic_0001>

<bundles_post_ra>
// kernel: tpu_custom_call.1
= control target key start
LH: loop header
LB: loop body
LE: loop exit
PB: predicated region body
PF: predicated region fallthrough
CT: control target
= control target key end

     0   :  { %s4748_s0 = inlined_call_operand.hbm [shape: f32[8,8,32], index: 0, kind: input, shape index: {}]   ;;  %s4749_s1 = inlined_call_operand.hbm [shape: f32[8,1,8], index: 1, kind: input, shape index: {}]   ;;  %s4750_s2 = inlined_call_operand.vmem [shape: bf16[32,96], index: 2, kind: input, shape index: {}]   ;;  %s4751_s3 = inlined_call_operand.vmem [shape: f32[1,96], index: 3, kind: input, shape index: {}]   ;;  %s4752_s4 = inlined_call_operand.vmem [shape: bf16[32,32], index: 4, kind: input, shape index: {}]   ;;  %s4753_s5 = inlined_call_operand.vmem [shape: f32[1,32], index: 5, kind: input, shape index: {}]   ;;  %s4754_s6 = inlined_call_operand.hbm [shape: f32[1,32], index: 6, kind: input, shape index: {}]   ;;  %s4755_s7 = inlined_call_operand.hbm [shape: f32[1,32], index: 7, kind: input, shape index: {}]   ;;  %s4756_s8 = inlined_call_operand.vmem [shape: bf16[32,64], index: 8, kind: input, shape index: {}]   ;;  %s4757_s9 = inlined_call_operand.hbm [shape: f32[1,64], index: 9, kind: input, shape index: {}]   ;;  %s4758_s10 = inlined_call_operand.vmem [shape: bf16[64,32], index: 10, kind: input, shape index: {}]   ;;  %s4759_s11 = inlined_call_operand.vmem [shape: f32[1,32], index: 11, kind: input, shape index: {}]   ;;  %s4760_s12 = inlined_call_operand.vmem [shape: f32[1,32], index: 12, kind: input, shape index: {}]   ;;  %s4761_s13 = inlined_call_operand.vmem [shape: f32[1,32], index: 13, kind: input, shape index: {}]   ;;  %s4762_s14 = inlined_call_operand.hbm [shape: f32[8,8,32], index: 14, kind: output, shape index: {}]  }
   0x1   :  { %4774 = sst [smem:[#allocation23_spill]] %s4748_s0 }
   0x2   :  { %4775 = sst [smem:[#allocation24_spill]] %s4754_s6 }
   0x3   :  { %4776 = sst [smem:[#allocation25_spill]] %s4755_s7 }
   0x4   :  { %4777 = sst [smem:[#allocation26_spill]] %s4757_s9 }
   0x5   :  { %4778 = sst [smem:[#allocation27_spill]] %s4761_s13 }
   0x6   :  { %4779 = sst [smem:[#allocation28_spill]] %s4762_s14 }
   0x7   :  { %19 = vsyncpa [#allocation3], 0 }
   0x8   :  { %21 = vsyncpa [#allocation3 + $0x1], 0 }
   0x9   :  { %22 = vsyncpa [#allocation6], 0 }
   0xa   :  { %24 = vsyncpa [#allocation6 + $0x1], 0 }
   0xb   :  { %25 = vsyncpa [#allocation9], 0 }
   0xc   :  { %26 = vsyncpa [#allocation4], 0 }
   0xd   :  { %28 = vsyncpa [#allocation4 + $0x1], 0  ;;  %s4044_s29 = smov 0   ;;  %s4046_s30 = smov 0  }
   0xe   :  { %s4048_s15 = smov 0   ;;  %s4050_s16 = smov 0  }
   0xf LB: > { %4780 = sst [smem:[#allocation17_spill]] %s3928_s29  ;;  %s4065_s17 = sadd.s32 4294967295, %s3940_s16   ;;  %s3940_s16 = sphi %s4050_s16, %s4811_s16   ;;  %s3936_s15 = sphi %s4048_s15, %s4813_s15   ;;  %s3932_s30 = sphi %s4046_s30, %s4815_s30   ;;  %s3928_s29 = sphi %s4044_s29, %s4814_s29  }
  0x10   : > { %4781 = sst [smem:[#allocation18_spill]] %s3936_s15  ;;  %s3096_s18 = sadd.s32 4294967294, %s3940_s16  }
  0x11   : > { %p54_p0 = scmp.ne.s32.totalorder %s3932_s30, %s3928_s29  ;;  %p4764_p1 = scmp.eq.s32.totalorder %s4065_s17, 0 }
  0x12   : > { %p362_p3 = scmp.eq.s32.totalorder %s3096_s18, 1  ;;  %p3097_p5 = scmp.ge.s32.totalorder %s3940_s16, 1 }
  0x13   : > { %p4074_p4 = por %p4764_p1, %p54_p0  ;;  %p369_p7 = scmp.lt.s32.totalorder %s3940_s16, 3 }
  0x14   : > { %p4079_p6 = por %p362_p3, %p54_p0  ;;  %s3942_s22 = smov [#allocation7]  }
  0x15   : > { %s4782_s19 = scalar_select %p4074_p4, 1, 0 }
  0x16   : > { %s4783_s20 = scalar_select %p4079_p6, 1, 0 }
  0x17   : > { %p4084_p8 = pnand %p3097_p5, %p369_p7  ;;  %s394_s23 = sshll.u32 %s3942_s22, 4  ;;  %s395_s23 = int_to_ptr.vmem [resolvable:$true] %s394_s23 }
  0x18   : > { %4784 = sst [smem:[#allocation19_spill]] %s4783_s20  ;;  %s3943_s24 = smov [#allocation8]  }
  0x19   : > { %p3513_p10 = pneg %p4084_p8  ;;  %s405_s25 = sshll.u32 %s3943_s24, 4  ;;  %s406_s25 = int_to_ptr.vmem [resolvable:$true] %s405_s25 }
  0x1a   : > { %s3944_s27 = smov [#allocation10]   ;;  %s3741_s18 = scalar_lea.vmem %s395_s23, 16 }
  0x1b   : > { %p4093_p11 = pnand %p3513_p10, %p4764_p1  ;;  %s419_s28 = sshll.u32 %s3944_s27, 4  ;;  %s4097_s28 = int_to_ptr.vmem [resolvable:$true] %s419_s28 }
  0x1c   : > { %p3742_p13 = scmp.ne.s32.totalorder %s395_s23, %s3741_s18  ;;  %s3748_s22 = scalar_lea.vmem %s395_s23, 32 }
  0x1d   : > { %p3732_p12 = pneg %p4093_p11  ;;  %p3749_p5 = scmp.lt.s32.totalorder %s395_s23, %s395_s23 }
  0x1e   : > { %p3750_p7 = scmp.lt.s32.totalorder %s3748_s22, %s3741_s18 }
  0x1f   : > { %p3744_p0 = pnand %p3742_p13, %p3732_p12 }
  0x20   : > { %p3751_p10 = por %p3750_p7, %p3749_p5 }
  0x21   : > { %p3745_p3 = pneg %p3744_p0 }
  0x23   : > { %p3752_p9 = pnand %p3751_p10, %p3745_p3 }
  0x25   : > { %3755 = shalt.err (!%p3752_p9)
}
  0x26   : > { %s4787_s6 = sld [smem:[#allocation24_spill]]  ;;  %s3767_s20 = scalar_lea.vmem %s406_s25, 16 }
  0x27   : > { %p3768_p1 = scmp.ne.s32.totalorder %s406_s25, %s3767_s20  ;;  %s3774_s29 = scalar_lea.vmem %s406_s25, 32 }
  0x28   : > { %p3775_p0 = scmp.lt.s32.totalorder %s406_s25, %s406_s25  ;;  %p3776_p6 = scmp.lt.s32.totalorder %s3774_s29, %s3767_s20 }
  0x29   : > { %p3770_p2 = pnand %p3768_p1, %p3732_p12 }
  0x2a   : > { %p3777_p4 = por %p3776_p6, %p3775_p0 }
  0x2b   : > { %p3771_p13 = pneg %p3770_p2 }
  0x2c   : > { %3516 = dma.hbm_to_vmem [thread:$0]  (!%p4093_p11), %s4787_s6, 16, %s395_s23, [#allocation6]  }
  0x2d   : > { %p3778_p5 = pnand %p3777_p4, %p3771_p13 }
  0x2f   : > { %3781 = shalt.err (!%p3778_p5)
}
  0x30   : > { %s4788_s7 = sld [smem:[#allocation25_spill]]  ;;  %s3793_s23 = scalar_lea.vmem %s4097_s28, 16 }
  0x31   : > { %p3794_p1 = scmp.ne.s32.totalorder %s4097_s28, %s3793_s23  ;;  %s3800_s29 = scalar_lea.vmem %s4097_s28, 32 }
  0x32   : > { %p3801_p4 = scmp.lt.s32.totalorder %s4097_s28, %s4097_s28  ;;  %p3802_p6 = scmp.lt.s32.totalorder %s3800_s29, %s3793_s23 }
  0x33   : > { %p3796_p2 = pnand %p3794_p1, %p3732_p12 }
  0x34   : > { %p3803_p3 = por %p3802_p6, %p3801_p4 }
  0x35   : > { %p3797_p9 = pneg %p3796_p2 }
  0x36   : > { %3519 = dma.hbm_to_vmem [thread:$0]  (!%p4093_p11), %s4788_s7, 16, %s406_s25, [#allocation9]  }
  0x37   : > { %p3804_p7 = pnand %p3803_p3, %p3797_p9 }
  0x39   : > { %3807 = shalt.err (!%p3804_p7)
}
  0x3a   : > { %s4789_s9 = sld [smem:[#allocation26_spill]]  ;;  %s4132_s25 = sadd.s32 1, %s3940_s16  }
  0x3b   : > { %4790 = sst [smem:[#allocation20_spill]] %s4132_s25  ;;  %s38_s26 = ssub.s32 %s3940_s16, %s4132_s25 }
  0x3c   : > { %s41_s27 = sadd.s32 1, %s3936_s15  ;;  %p39_p12 = scmp.eq.s32.totalorder %s38_s26, 0 }
  0x3d   : > { %p48_p10 = scmp.ne.s32.totalorder %s3936_s15, %s3932_s30  ;;  %p49_p13 = scmp.eq.s32.totalorder %s3940_s16, 0 }
  0x3e   : > { %p3537_p0 = scmp.lt.s32.totalorder %s3940_s16, 2  ;;  %p4792_p1 = scmp.eq.s32.totalorder %s4065_s17, 1 }
  0x3f   : > { %s4142_s18 = scalar_select %p39_p12, %s3936_s15, %s41_s27  }
  0x40   : > { %3522 = dma.hbm_to_vmem [thread:$0]  (!%p4093_p11), %s4789_s9, 16, %s4097_s28, [#allocation9]  }
  0x41   : > { %4791 = sst [smem:[#allocation21_spill]] %s4142_s18  ;;  %p50_p5 = por %p49_p13, %p48_p10 }
  0x42   : > { %p4146_p2 = por %p4792_p1, %p48_p10  ;;  %s4151_s23 = sand.u32 1, %s3936_s15  }
  0x43   : > { %s3182_s28 = sshll.u32 %s3940_s16, 9  ;;  %s3102_s29 = sshll.u32 %s4151_s23, 5 }
  0x44   : > { %s4793_s22 = scalar_select %p4146_p2, 1, 0 }
  0x45   : > { %s4795_s0 = sld [smem:[#allocation23_spill]]  ;;  %s446_s27 = scalar_lea.vmem [#allocation2], %s3102_s29 }
  0x46   : > { %4794 = sst [smem:[#allocation22_spill]] %s4793_s22  ;;  %s453_s6 = sshll.u32 %s446_s27, 4  ;;  %s4164_s6 = int_to_ptr.vmem [resolvable:$true] %s453_s6 }
  0x47   : > { %p4160_p11 = pnand %p3537_p0, %p50_p5 }
  0x49   : > { %p3810_p4 = pneg %p4160_p11 }
  0x4b   : > { %s4158_s26 = scalar_lea.hbm %s4795_s0, %s3182_s28  ;;  %s3813_s20 = scalar_lea.hbm %s4795_s0, 1024 }
  0x4c   : > { %s3808_s18 = scalar_lea.hbm %s4158_s26, 512  ;;  %p3814_p7 = scmp.lt.s32.totalorder %s4158_s26, %s4795_s0 }
  0x4d   : > { %p3809_p9 = scmp.ne.s32.totalorder %s4158_s26, %s3808_s18  ;;  %p3815_p12 = scmp.lt.s32.totalorder %s3813_s20, %s3808_s18 }
  0x4f   : > { %p3811_p6 = pnand %p3810_p4, %p3809_p9  ;;  %p3816_p10 = por %p3815_p12, %p3814_p7 }
  0x51   : > { %p3812_p3 = pneg %p3811_p6 }
  0x53   : > { %p3817_p13 = pnand %p3816_p10, %p3812_p3 }
  0x55   : > { %3820 = shalt.err (!%p3817_p13)
}
  0x56   : > { %s3821_s9 = scalar_lea.vmem %s4164_s6, 512  ;;  %s3945_s28 = smov [#allocation2]  }
  0x57   : > { %p3822_p0 = scmp.ne.s32.totalorder %s4164_s6, %s3821_s9  ;;  %s3826_s29 = sshll.u32 %s3945_s28, 4  ;;  %s3827_s29 = int_to_ptr.vmem [resolvable:$false] %s3826_s29 }
  0x58   : > { %s3828_s15 = scalar_lea.vmem %s3827_s29, 1024  ;;  %p3829_p9 = scmp.lt.s32.totalorder %s4164_s6, %s3827_s29 }
  0x59   : > { %p3824_p5 = pnand %p3822_p0, %p3810_p4  ;;  %p3830_p6 = scmp.lt.s32.totalorder %s3828_s15, %s3821_s9 }
  0x5b   : > { %p3825_p1 = pneg %p3824_p5  ;;  %p3831_p2 = por %p3830_p6, %p3829_p9 }
  0x5d   : > { %p3832_p7 = pnand %p3831_p2, %p3825_p1 }
  0x5f   : > { %3835 = shalt.err (!%p3832_p7)
}
  0x60   : > { %s3946_s18 = smov 128   ;;  %s3947_s20 = smov 8  }
  0x61   : > { %s4797_s24 = scalar_lea.sflag [#allocation3], %s4151_s23  ;;  %s463_s27 = sand.u32 1, %s3940_s16  }
  0x62   : > { %3526 = dma.hbm_to_vmem [thread:$0]  (!%p4160_p11), %s4158_s26, 512, %s4164_s6, %s4797_s24, %s3946_s18, %s3946_s18, %s3947_s20  }
  0x63   : > { %s3105_s28 = sshll.u32 %s4151_s23, 2  ;;  %s3183_s29 = sshll.u32 %s3940_s16, 6 }
  0x64   : > { %s467_s9 = scalar_lea.vmem [#allocation5], %s3105_s28  ;;  %s4199_s14 = scalar_lea.hbm %s4749_s1, %s3183_s29 }
  0x65   : > { %s474_s15 = sshll.u32 %s467_s9, 4  ;;  %s4203_s22 = scalar_lea.sflag [#allocation6], %s463_s27  ;;  %s4201_s15 = int_to_ptr.vmem [resolvable:$true] %s474_s15 }
  0x66   : > { %s3836_s13 = scalar_lea.hbm %s4199_s14, 64  ;;  %s3841_s26 = scalar_lea.hbm %s4749_s1, 128 }
  0x67   : > { %p3837_p2 = scmp.ne.s32.totalorder %s4199_s14, %s3836_s13  ;;  %p3842_p10 = scmp.lt.s32.totalorder %s4199_s14, %s4749_s1 }
  0x68   : > { %p3843_p13 = scmp.lt.s32.totalorder %s3841_s26, %s3836_s13 }
  0x69   : > { %p3839_p3 = pnand %p3837_p2, %p3810_p4 }
  0x6a   : > { %p3844_p0 = por %p3843_p13, %p3842_p10 }
  0x6b   : > { %p3840_p12 = pneg %p3839_p3 }
  0x6d   : > { %p3845_p5 = pnand %p3844_p0, %p3840_p12 }
  0x6f   : > { %3848 = shalt.err (!%p3845_p5)
}
  0x70   : > { %s3849_s18 = scalar_lea.vmem %s4201_s15, 64  ;;  %s3948_s20 = smov [#allocation5]  }
  0x71   : > { %p3850_p1 = scmp.ne.s32.totalorder %s4201_s15, %s3849_s18  ;;  %s3854_s24 = sshll.u32 %s3948_s20, 4  ;;  %s3855_s24 = int_to_ptr.vmem [resolvable:$false] %s3854_s24 }
  0x72   : > { %s3856_s27 = scalar_lea.vmem %s3855_s24, 128  ;;  %p3857_p7 = scmp.lt.s32.totalorder %s4201_s15, %s3855_s24 }
  0x73   : > { %p3852_p9 = pnand %p3850_p1, %p3810_p4  ;;  %p3858_p2 = scmp.lt.s32.totalorder %s3856_s27, %s3849_s18 }
  0x75   : > { %p3853_p6 = pneg %p3852_p9  ;;  %p3859_p3 = por %p3858_p2, %p3857_p7 }
  0x77   : > { %p3860_p10 = pnand %p3859_p3, %p3853_p6 }
  0x79   : > { %3863 = shalt.err (!%p3860_p10)
}
  0x7a   : > { %s3949_s13 = smov 16   ;;  %s3950_s28 = smov 1  }
  0x7b   : > { %3529 = dma.hbm_to_vmem [thread:$0]  (!%p4160_p11), %s4199_s14, 64, %s4201_s15, %s4203_s22, %s3949_s13, %s3949_s13, %s3950_s28  }
  0x7c   : > { %486 = sbr.rel (%p4084_p8) target bundleno = 4306 (0x10d2), region = 76  ;;  %s4231_s29 = sand.u32 (!%p4084_p8), 1, %s3932_s30  }
  0x7d   : > { %s3109_s9 = sshll.u32 (!%p4084_p8), %s4231_s29, 5  ;;  %s489_s6 = scalar_lea.sflag (!%p4084_p8), [#allocation3], %s4231_s29 }
  0x7e   : > { %s4237_s23 = scalar_lea.vmem (!%p4084_p8), [#allocation2], %s3109_s9  ;;  %p4798_p4 = scmp.ne.s32.totalorder (!%p4084_p8), %s4782_s19, 0 }
  0x81   : > { %3907 = dma.done.wait (%p4798_p4), %s489_s6, 512  }
  0x82   : > { %3909 = vsyncadd (%p4798_p4), %s489_s6, 4294966784  ;;  %s497_s7 = sand.u32 1, %s4065_s17   ;;  %s3110_s14 = sshll.u32 %s4231_s29, 2 }
  0x83   : > { %s498_s21 = scalar_lea.sflag [#allocation6], %s497_s7  ;;  %s4245_s22 = scalar_lea.vmem [#allocation5], %s3110_s14 }
  0x84   : > { %3911 = dma.done.wait (%p4798_p4), %s498_s21, 64  }
  0x85   : > { %3913 = vsyncadd (%p4798_p4), %s498_s21, 4294967232  ;;  %p4799_p8 = scmp.eq.s32.totalorder %s4065_s17, 0 }
  0x87   : > { %3915 = dma.done.wait (%p4799_p8), [#allocation6], 16   ;;  %p4800_p11 = pmov %p4799_p8 }
  0x88   : > { %p4801_p12 = pmov %p4799_p8 }
  0x89   : > { %3917 = vsyncadd (%p4800_p11), [#allocation6], 4294967280 }
  0x8a   : > { %3919 = dma.done.wait (%p4801_p12), [#allocation9], 32   ;;  %p4802_p13 = pmov %p4799_p8 }
  0x8b   : > { %v3628_v0 = vld [vmem:[%s4750_s2 + $0x8] sm:$0xff]   ;;  %v3629_v1 = vld [vmem:[%s4750_s2] sm:$0xff]   ;;  %vm624_vm0 = vcmask 261120   ;;  %v569_v4 = vld [vmem:[%s4237_s23 + $0x10] sm:$0xff]  ;;  %v3951_v8 = vmov 0.0   ;;  %vm3952_vm1 = vmmov 0  }
  0x8c   : > { %3921 = vsyncadd (%p4802_p13), [#allocation9], 4294967264  ;;  %3267 = vmatprep.subr.bf16.mxu0 %v3628_v0  ;;  %v567_v2 = vld [vmem:[%s4237_s23] sm:$0xff]  ;;  %v568_v3 = vld [vmem:[%s4237_s23 + $0x8] sm:$0xff]  ;;  %3275 = vmatprep.subr.bf16.mxu1 %v3951_v8  ;;  %s3953_s20 = smov 96   ;;  %vm687_vm2 = vcmask 64512  }
  0x8d   : > { %3268 = vmatpush3.bf16.msra.mxu0 %v3628_v0  ;;  %v571_v5 = vpack.c.bf16 %v568_v3, %v567_v2  ;;  %v570_v6 = vld [vmem:[%s4237_s23 + $0x18] sm:$0xff]  ;;  %v3119_v9 = vld [vmem:[%s4751_s3] ss:$0 sm:$0xff]  ;;  %3277 = vmatprep.mubr.msk.bf16.mxu1 %vm3952_vm1, %v3951_v8  ;;  %v4321_v34 = vld [vmem:[%s4245_s22 + $0x1] ss:$0 sm:$0xff]  ;;  %s3954_s24 = smov 64  }
  0x8e   : > { %3269 = vmatprep.subr.bf16.mxu0 %v3629_v1  ;;  %v572_v7 = vpack.c.bf16 %v570_v6, %v569_v4  ;;  %v4317_v30 = vld [vmem:[%s4245_s22] ss:$0 sm:$0xff]  ;;  %v4326_v41 = vld [vmem:[%s4245_s22 + $0x2] ss:$0 sm:$0xff]  ;;  %v4331_v48 = vld [vmem:[%s4245_s22 + $0x3] ss:$0 sm:$0xff] }
  0x8f   : > { %3271 = vmatprep.mubr.msk.bf16.mxu0 %vm624_vm0, %v571_v5  ;;  %vm934_vm3 = vcmask 1043456   ;;  %s3955_s27 = smov 88   ;;  %s3956_s13 = smov 120   ;;  %vm2494_vm4 = vcmask 130048   ;;  %vm2499_vm5 = vcmask 195584   ;;  %vm2820_vm6 = vcmask 523264  }
  0x90   : > { %s3957_s28 = smov 56   ;;  %s3958_s6 = smov 80  }
  0x91   : > { %3270 = vmatpush3.bf16.msra.mxu0 %v3629_v1  ;;  %s3959_s7 = smov 112   ;;  %s3960_s14 = smov 48  }
  0x92   : > { %3281 = vmatprep.subr.bf16.mxu0 %v3951_v8  ;;  %s3961_s21 = smov 72   ;;  %s3962_s22 = smov 104  }
  0x93   : > { %s3963_s15 = smov 40   ;;  %s3964_s26 = smov 8  }
  0x94   : > { %3272 = vmatmul.mubr.msk.bf16.vlgmr.msra.gmra.mxu0 %vm624_vm0, %v572_v7  ;;  %s3965_s19 = smov 16   ;;  %s4805_s0 = sld [smem:[#allocation28_spill]] }
  0x95   : > { %3283 = vmatprep.mubr.msk.bf16.mxu0 %vm3952_vm1, %v3951_v8  ;;  %s3967_s18 = smov [#allocation11]  }
 0x154   : > { %v3273_v10 = vpop.f32.mrf.mxu0 }
 0x155   : > { %v674_v11 = vadd.f32 %v3273_v10, %v3119_v9 }
 0x156   : > { %v665_v12 = vpop.f32.mrf.mxu0 }
 0x157   : > { %v4280_v13 = vpack.c.bf16 %v674_v11, %v674_v11  ;;  %v666_v14 = vadd.f32 %v3119_v9, %v665_v12 }
 0x158   : > { %v3274_v15 = vpop.f32.mrf.mxu0 }
 0x159   : > { %v4282_v16 = vpack.c.bf16 %v666_v14, %v666_v14  ;;  %v677_v17 = vadd.f32 %v3274_v15, %v3119_v9  ;;  %784 = vrot.lane.b32.xlu1 %v4280_v13, %s3953_s20 }
 0x15a   : > { %v668_v18 = vpop.f32.mrf.mxu0 }
 0x15b   : > { %v4285_v19 = vpack.c.bf16 %v677_v17, %v677_v17  ;;  %v669_v20 = vadd.f32 %v3119_v9, %v668_v18  ;;  %685 = vrot.lane.b32.xlu0 %v4282_v16, %s3953_s20 }
 0x15d   : > { %v4288_v21 = vpack.c.bf16 %v669_v20, %v669_v20  ;;  %833 = vrot.lane.b32.xlu1 %v4285_v19, %s3953_s20 }
 0x15f   : > { %735 = vrot.lane.b32.xlu0 %v4288_v21, %s3953_s20  ;;  %s3868_s20 = sshll.u32 %s3967_s18, 4  ;;  %s3869_s20 = int_to_ptr.vmem [resolvable:$false] %s3868_s20 }
 0x1cb   : > { %v785_v24 = vpop.permute.xlu1 %784 }
 0x1cc   : > { %v790_v27 = vsel %vm687_vm2, %v785_v24, 0 }
 0x1cd   : > { %v686_v22 = vpop.permute.xlu0 %685 }
 0x1ce   : > { %v692_v23 = vsel %vm687_vm2, %v686_v22, 0 }
 0x1cf   : > { %3276 = vmatpush3.bf16.xpose.msra.mxu1 %v692_v23  ;;  %v834_v28 = vpop.permute.xlu1 %833 }
 0x1d0   : > { %3287 = vmatprep.subr.bf16.mxu1 %v3951_v8  ;;  %v839_v29 = vsel %vm687_vm2, %v834_v28, 0 }
 0x1d1   : > { %v736_v25 = vpop.permute.xlu0 %735 }
 0x1d2   : > { %v741_v26 = vsel %vm687_vm2, %v736_v25, 0 }
 0x1d3   : > { %3282 = vmatpush3.bf16.xpose.msra.mxu0 %v741_v26 }
 0x1d4   : > { %3293 = vmatprep.subr.bf16.mxu0 %v3951_v8 }
 0x1d6   : > { %3278 = vmatmul.mubr.msk.bf16.vlgmr.msra.gmra.mxu1 %vm687_vm2, %v4282_v16 }
 0x1d7   : > { %3288 = vmatpush3.bf16.xpose.msra.mxu1 %v790_v27  ;;  %3289 = vmatprep.mubr.msk.bf16.mxu1 %vm3952_vm1, %v3951_v8 }
 0x1d8   : > { %3299 = vmatprep.subr.bf16.mxu1 %v3951_v8 }
 0x1da   : > { %3284 = vmatmul.mubr.msk.bf16.vlgmr.msra.gmra.mxu0 %vm687_vm2, %v4288_v21 }
 0x1db   : > { %3294 = vmatpush3.bf16.xpose.msra.mxu0 %v839_v29  ;;  %3295 = vmatprep.mubr.msk.bf16.mxu0 %vm3952_vm1, %v3951_v8 }
 0x1dc   : > { %3305 = vmatprep.subr.bf16.mxu0 %v3951_v8 }
 0x1de   : > { %3290 = vmatmul.mubr.msk.bf16.vlgmr.msra.gmra.mxu1 %vm687_vm2, %v4280_v13 }
 0x1df   : > { %3301 = vmatprep.mubr.msk.bf16.mxu1 %vm3952_vm1, %v3951_v8 }
 0x1e2   : > { %3296 = vmatmul.mubr.msk.bf16.vlgmr.msra.gmra.mxu0 %vm687_vm2, %v4285_v19 }
 0x1e3   : > { %3307 = vmatprep.mubr.msk.bf16.mxu0 %vm3952_vm1, %v3951_v8 }
 0x296   : > { %v728_v31 = vpop.f32.mrf.mxu1 }
 0x297   : > { %v729_v32 = vadd.f32 %v4317_v30, %v728_v31 }
 0x298   : > { %v3279_v33 = vpop.f32.mrf.mxu1 }
 0x299   : > { %v881_v35 = vsel %vm687_vm2, %v729_v32, -inf }
 0x29a   : > { %882 = vmax.xlane.f32.xlu0 %v881_v35  ;;  %v731_v36 = vpop.f32.mrf.mxu1  ;;  %v777_v37 = vpop.f32.mrf.mxu0 }
 0x29b   : > { %v778_v38 = vadd.f32 %v4321_v34, %v777_v37 }
 0x29c   : > { %v3280_v39 = vpop.f32.mrf.mxu1  ;;  %v3285_v40 = vpop.f32.mrf.mxu0 }
 0x29d   : > { %v884_v42 = vsel %vm687_vm2, %v778_v38, -inf }
 0x29e   : > { %v826_v43 = vpop.f32.mrf.mxu1  ;;  %885 = vmax.xlane.f32.xlu1 %v884_v42  ;;  %v780_v44 = vpop.f32.mrf.mxu0 }
 0x29f   : > { %v827_v45 = vadd.f32 %v4326_v41, %v826_v43 }
 0x2a0   : > { %v3286_v46 = vpop.f32.mrf.mxu0  ;;  %v3291_v47 = vpop.f32.mrf.mxu1 }
 0x2a1   : > { %v887_v49 = vsel %vm687_vm2, %v827_v45, -inf }
 0x2a2   : > { %888 = vmax.xlane.f32.xlu0 %v887_v49  ;;  %v829_v50 = vpop.f32.mrf.mxu1  ;;  %v875_v51 = vpop.f32.mrf.mxu0 }
 0x2a3   : > { %v876_v52 = vadd.f32 %v4331_v48, %v875_v51 }
 0x2a4   : > { %v3292_v53 = vpop.f32.mrf.mxu1  ;;  %v3297_v54 = vpop.f32.mrf.mxu0 }
 0x2a5   : > { %v890_v55 = vsel %vm687_vm2, %v876_v52, -inf }
 0x2a6   : > { %891 = vmax.xlane.f32.xlu0 %v890_v55  ;;  %v878_v56 = vpop.f32.mrf.mxu0 }
 0x2a8   : > { %v3298_v57 = vpop.f32.mrf.mxu0 }
 0x2af   : > { %929 = vrot.lane.b32.xlu1 %v4282_v16, %s3954_s24 }
 0x323   : > { %v883_v58 = vpop.xlane.xlu0 %882 }
 0x324   : > { %v893_v59 = vsub.f32 %v729_v32, %v883_v58 }
 0x326   : > { %v897_v60 = vmul.f32 1.442695, %v893_v59 }
 0x327   : > { %v886_v61 = vpop.xlane.xlu1 %885 }
 0x328   : > { %3638 = vpow2.f32 %v897_v60  ;;  %v894_v62 = vsub.f32 %v778_v38, %v886_v61 }
 0x32a   : > { %v899_v63 = vmul.f32 1.442695, %v894_v62 }
 0x32b   : > { %v930_v0 = vpop.permute.xlu1 %929  ;;  %v889_v6 = vpop.xlane.xlu0 %888 }
 0x32c   : > { %3640 = vpow2.f32 %v899_v63  ;;  %v936_v1 = vsel %vm934_vm3, %v930_v0, 0  ;;  %v895_v9 = vsub.f32 %v827_v45, %v889_v6 }
 0x32d   : > { %3300 = vmatpush3.bf16.msra.mxu1 %v936_v1 }
 0x32e   : > { %3311 = vmatprep.subr.bf16.mxu1 %v3951_v8  ;;  %v901_v11 = vmul.f32 1.442695, %v895_v9 }
 0x32f   : > { %v892_v7 = vpop.xlane.xlu0 %891 }
 0x330   : > { %v896_v10 = vsub.f32 %v876_v52, %v892_v7  ;;  %3642 = vpow2.f32 %v901_v11 }
 0x332   : > { %v903_v12 = vmul.f32 1.442695, %v896_v10 }
 0x334   : > { %3644 = vpow2.f32 %v903_v12 }
 0x335   : > { %v3639_v2 = vpop.eup %3638 }
 0x336   : > { %v905_v3 = vsel %vm687_vm2, %v3639_v2, 0.0 }
 0x337   : > { %906 = vadd.xlane.f32.xlu1 %v905_v3 }
 0x339   : > { %v3641_v4 = vpop.eup %3640 }
 0x33a   : > { %v908_v5 = vsel %vm687_vm2, %v3641_v4, 0.0 }
 0x33b   : > { %909 = vadd.xlane.f32.xlu0 %v908_v5 }
 0x33d   : > { %v3643_v14 = vpop.eup %3642 }
 0x33e   : > { %v911_v17 = vsel %vm687_vm2, %v3643_v14, 0.0 }
 0x341   : > { %v3645_v15 = vpop.eup %3644 }
 0x342   : > { %v914_v18 = vsel %vm687_vm2, %v3645_v15, 0.0 }
 0x348   : > { %1026 = vrot.lane.b32.xlu1 %v4280_v13, %s3954_s24 }
 0x34c   : > { %1074 = vrot.lane.b32.xlu1 %v4285_v19, %s3954_s24 }
 0x351   : > { %978 = vrot.lane.b32.xlu0 %v4288_v21, %s3954_s24  ;;  %s3966_s24 = smov 24  }
 0x370   : > { %912 = vadd.xlane.f32.xlu1 %v911_v17  ;;  %915 = vadd.xlane.f32.xlu0 %v914_v18 }
 0x381   : > { %1174 = vrot.lane.b32.xlu1 %v4288_v21, %s3955_s27 }
 0x385   : > { %1172 = vrot.lane.b32.xlu1 %v4288_v21, %s3956_s13 }
 0x386   : > { %1124 = vrot.lane.b32.xlu0 %v4282_v16, %s3955_s27 }
 0x389   : > { %1274 = vrot.lane.b32.xlu1 %v4285_v19, %s3955_s27 }
 0x38a   : > { %1122 = vrot.lane.b32.xlu0 %v4282_v16, %s3956_s13 }
 0x38d   : > { %1272 = vrot.lane.b32.xlu1 %v4285_v19, %s3956_s13 }
 0x38e   : > { %1224 = vrot.lane.b32.xlu0 %v4280_v13, %s3955_s27 }
 0x392   : > { %1222 = vrot.lane.b32.xlu0 %v4280_v13, %s3956_s13 }
 0x3c0   : > { %v907_v20 = vpop.xlane.xlu1 %906 }
 0x3c1   : > { %3646 = vrcp.f32 %v907_v20 }
 0x3c4   : > { %v910_v22 = vpop.xlane.xlu0 %909  ;;  %v1027_v26 = vpop.permute.xlu1 %1026 }
 0x3c5   : > { %3648 = vrcp.f32 %v910_v22  ;;  %v1032_v31 = vsel %vm934_vm3, %v1027_v26, 0 }
 0x3c8   : > { %v979_v23 = vpop.permute.xlu0 %978  ;;  %v1075_v33 = vpop.permute.xlu1 %1074 }
 0x3c9   : > { %v984_v24 = vsel %vm934_vm3, %v979_v23, 0  ;;  %v1080_v36 = vsel %vm934_vm3, %v1075_v33, 0 }
 0x3ca   : > { %3306 = vmatpush3.bf16.msra.mxu0 %v984_v24 }
 0x3cb   : > { %3317 = vmatprep.subr.bf16.mxu0 %v3951_v8 }
 0x3ce   : > { %v3647_v25 = vpop.eup %3646 }
 0x3cf   : > { %v921_v27 = vmul.f32 %v3647_v25, %v3639_v2 }
 0x3d1   : > { %v925_v28 = vpack.c.bf16 %v921_v27, %v921_v27 }
 0x3d2   : > { %v3649_v29 = vpop.eup %3648 }
 0x3d3   : > { %3302 = vmatmul.mubr.msk.bf16.vlgmr.msra.gmra.mxu1 %vm687_vm2, %v925_v28  ;;  %v922_v32 = vmul.f32 %v3649_v29, %v3641_v4 }
 0x3d4   : > { %3312 = vmatpush3.bf16.msra.mxu1 %v1032_v31  ;;  %3313 = vmatprep.mubr.msk.bf16.mxu1 %vm3952_vm1, %v3951_v8 }
 0x3d5   : > { %v926_v35 = vpack.c.bf16 %v922_v32, %v922_v32  ;;  %3323 = vmatprep.subr.bf16.mxu1 %v3951_v8 }
 0x3d7   : > { %3308 = vmatmul.mubr.msk.bf16.vlgmr.msra.gmra.mxu0 %vm687_vm2, %v926_v35 }
 0x3d8   : > { %3318 = vmatpush3.bf16.msra.mxu0 %v1080_v36  ;;  %3319 = vmatprep.mubr.msk.bf16.mxu0 %vm3952_vm1, %v3951_v8 }
 0x3d9   : > { %3329 = vmatprep.subr.bf16.mxu0 %v3951_v8 }
 0x3f9   : > { %v913_v37 = vpop.xlane.xlu1 %912  ;;  %v916_v38 = vpop.xlane.xlu0 %915 }
 0x3fa   : > { %3650 = vrcp.f32 %v913_v37 }
 0x3fb   : > { %3652 = vrcp.f32 %v916_v38 }
 0x3fd   : > { %v1125_v39 = vpop.permute.xlu0 %1124  ;;  %v1175_v40 = vpop.permute.xlu1 %1174 }
 0x3fe   : > { %v1130_v50 = vsel %vm687_vm2, %v1125_v39, 0  ;;  %v1180_v52 = vsel %vm687_vm2, %v1175_v40, 0 }
 0x401   : > { %v1123_v47 = vpop.permute.xlu0 %1122  ;;  %v1173_v51 = vpop.permute.xlu1 %1172 }
 0x405   : > { %v1225_v53 = vpop.permute.xlu0 %1224  ;;  %v1275_v54 = vpop.permute.xlu1 %1274 }
 0x406   : > { %v1230_v55 = vsel %vm687_vm2, %v1225_v53, 0  ;;  %v1280_v56 = vsel %vm687_vm2, %v1275_v54, 0 }
 0x407   : > { %v3651_v42 = vpop.eup %3650 }
 0x408   : > { %v3653_v43 = vpop.eup %3652  ;;  %v923_v44 = vmul.f32 %v3651_v42, %v3643_v14 }
 0x409   : > { %v924_v45 = vmul.f32 %v3653_v43, %v3645_v15  ;;  %v1223_v57 = vpop.permute.xlu0 %1222  ;;  %v1273_v58 = vpop.permute.xlu1 %1272 }
 0x40a   : > { %v927_v46 = vpack.c.bf16 %v923_v44, %v923_v44 }
 0x40b   : > { %v928_v49 = vpack.c.bf16 %v924_v45, %v924_v45 }
 0x40c   : > { %3314 = vmatmul.mubr.msk.bf16.vlgmr.msra.gmra.mxu1 %vm687_vm2, %v927_v46 }
 0x40d   : > { %3320 = vmatmul.mubr.msk.bf16.vlgmr.msra.gmra.mxu0 %vm687_vm2, %v928_v49  ;;  %3324 = vmatpush3.bf16.xpose.msra.mxu1 %v1130_v50 }
 0x40e   : > { %3330 = vmatpush3.bf16.xpose.msra.mxu0 %v1180_v52  ;;  %3325 = vmatprep.mubr.msk.bf16.mxu1 %vm3952_vm1, %v3951_v8 }
 0x40f   : > { %3331 = vmatprep.mubr.msk.bf16.mxu0 %vm3952_vm1, %v3951_v8  ;;  %3335 = vmatprep.subr.bf16.mxu1 %v3951_v8 }
 0x410   : > { %3341 = vmatprep.subr.bf16.mxu0 %v3951_v8 }
 0x414   : > { %3326 = vmatmul.mubr.msk.bf16.vlgmr.msra.gmra.mxu1 %vm687_vm2, %v1123_v47 }
 0x415   : > { %3332 = vmatmul.mubr.msk.bf16.vlgmr.msra.gmra.mxu0 %vm687_vm2, %v1173_v51  ;;  %3336 = vmatpush3.bf16.xpose.msra.mxu1 %v1230_v55 }
 0x416   : > { %3342 = vmatpush3.bf16.xpose.msra.mxu0 %v1280_v56  ;;  %3337 = vmatprep.mubr.msk.bf16.mxu1 %vm3952_vm1, %v3951_v8 }
 0x417   : > { %3343 = vmatprep.mubr.msk.bf16.mxu0 %vm3952_vm1, %v3951_v8  ;;  %3347 = vmatprep.subr.bf16.mxu1 %v3951_v8 }
 0x418   : > { %3353 = vmatprep.subr.bf16.mxu0 %v3951_v8 }
 0x41c   : > { %3338 = vmatmul.mubr.msk.bf16.vlgmr.msra.gmra.mxu1 %vm687_vm2, %v1223_v57 }
 0x41d   : > { %3344 = vmatmul.mubr.msk.bf16.vlgmr.msra.gmra.mxu0 %vm687_vm2, %v1273_v58  ;;  %3349 = vmatprep.mubr.msk.bf16.mxu1 %vm3952_vm1, %v3951_v8 }
 0x41e   : > { %3355 = vmatprep.mubr.msk.bf16.mxu0 %vm3952_vm1, %v3951_v8 }
 0x493   : > { %v4392_v59 = vpop.f32.mrf.mxu1 }
 0x495   : > { %v3303_v60 = vpop.f32.mrf.mxu1 }
 0x497   : > { %v975_v61 = vpop.f32.mrf.mxu1  ;;  %v4394_v62 = vpop.f32.mrf.mxu0 }
 0x499   : > { %v3304_v63 = vpop.f32.mrf.mxu1  ;;  %v3309_v0 = vpop.f32.mrf.mxu0 }
 0x49b   : > { %v1023_v1 = vpop.f32.mrf.mxu0 }
 0x49d   : > { %v3310_v2 = vpop.f32.mrf.mxu0 }
 0x4cc   : > { %v4396_v3 = vpop.f32.mrf.mxu1 }
 0x4cd   : > { %v4398_v4 = vpop.f32.mrf.mxu0 }
 0x4ce   : > { %v3315_v5 = vpop.f32.mrf.mxu1 }
 0x4cf   : > { %v3321_v6 = vpop.f32.mrf.mxu0 }
 0x4d0   : > { %v1071_v7 = vpop.f32.mrf.mxu1 }
 0x4d1   : > { %v1119_v9 = vpop.f32.mrf.mxu0 }
 0x4d2   : > { %v3316_v10 = vpop.f32.mrf.mxu1 }
 0x4d3   : > { %v3322_v11 = vpop.f32.mrf.mxu0 }
 0x4d4   : > { %v1166_v12 = vpop.f32.mrf.mxu1 }
 0x4d5   : > { %v1167_v14 = vadd.f32 %v4317_v30, %v1166_v12  ;;  %v1216_v15 = vpop.f32.mrf.mxu0 }
 0x4d6   : > { %v1217_v17 = vadd.f32 %v4321_v34, %v1216_v15  ;;  %v3327_v18 = vpop.f32.mrf.mxu1 }
 0x4d7   : > { %v3333_v20 = vpop.f32.mrf.mxu0  ;;  %v1322_v22 = vsel %vm687_vm2, %v1167_v14, -inf }
 0x4d8   : > { %v1325_v23 = vsel %vm687_vm2, %v1217_v17, -inf  ;;  %1323 = vmax.xlane.f32.xlu0 %v1322_v22  ;;  %v1169_v24 = vpop.f32.mrf.mxu1 }
 0x4d9   : > { %1326 = vmax.xlane.f32.xlu1 %v1325_v23  ;;  %v1219_v25 = vpop.f32.mrf.mxu0 }
 0x4da   : > { %v3328_v26 = vpop.f32.mrf.mxu1 }
 0x4db   : > { %v3334_v27 = vpop.f32.mrf.mxu0 }
 0x4dc   : > { %v1266_v28 = vpop.f32.mrf.mxu1 }
 0x4dd   : > { %v1267_v29 = vadd.f32 %v4326_v41, %v1266_v28  ;;  %v1316_v31 = vpop.f32.mrf.mxu0 }
 0x4de   : > { %v3339_v32 = vpop.f32.mrf.mxu1  ;;  %v1317_v33 = vadd.f32 %v4331_v48, %v1316_v31 }
 0x4df   : > { %v3345_v35 = vpop.f32.mrf.mxu0  ;;  %v1328_v36 = vsel %vm687_vm2, %v1267_v29, -inf }
 0x4e0   : > { %1329 = vmax.xlane.f32.xlu0 %v1328_v36  ;;  %v1269_v37 = vpop.f32.mrf.mxu1  ;;  %v1331_v42 = vsel %vm687_vm2, %v1317_v33, -inf }
 0x4e1   : > { %v1319_v38 = vpop.f32.mrf.mxu0 }
 0x4e2   : > { %v3340_v39 = vpop.f32.mrf.mxu1 }
 0x4e3   : > { %v3346_v40 = vpop.f32.mrf.mxu0 }
 0x4e4   : > { %1332 = vmax.xlane.f32.xlu0 %v1331_v42 }
 0x4ea   : > { %1370 = vrot.lane.b32.xlu1 %v4282_v16, %s3957_s28 }
 0x561   : > { %v1324_v43 = vpop.xlane.xlu0 %1323 }
 0x562   : > { %v1327_v44 = vpop.xlane.xlu1 %1326  ;;  %v1334_v45 = vsub.f32 %v1167_v14, %v1324_v43 }
 0x563   : > { %v1335_v46 = vsub.f32 %v1217_v17, %v1327_v44 }
 0x564   : > { %v1338_v47 = vmul.f32 1.442695, %v1334_v45 }
 0x565   : > { %v1340_v49 = vmul.f32 1.442695, %v1335_v46 }
 0x566   : > { %3654 = vpow2.f32 %v1338_v47  ;;  %v1371_v50 = vpop.permute.xlu1 %1370 }
 0x567   : > { %3656 = vpow2.f32 %v1340_v49  ;;  %v1376_v51 = vsel %vm934_vm3, %v1371_v50, 0 }
 0x568   : > { %3348 = vmatpush3.bf16.msra.mxu1 %v1376_v51 }
 0x569   : > { %3359 = vmatprep.subr.bf16.mxu1 %v3951_v8  ;;  %v1330_v56 = vpop.xlane.xlu0 %1329 }
 0x56a   : > { %v1336_v60 = vsub.f32 %v1267_v29, %v1330_v56 }
 0x56c   : > { %v1342_v63 = vmul.f32 1.442695, %v1336_v60 }
 0x56d   : > { %v1333_v57 = vpop.xlane.xlu0 %1332 }
 0x56e   : > { %v1337_v58 = vsub.f32 %v1317_v33, %v1333_v57 }
 0x570   : > { %v1344_v61 = vmul.f32 1.442695, %v1337_v58 }
 0x572   : > { %3658 = vpow2.f32 %v1344_v61 }
 0x573   : > { %v3655_v52 = vpop.eup %3654  ;;  %3660 = vpow2.f32 %v1342_v63 }
 0x574   : > { %v3657_v53 = vpop.eup %3656  ;;  %v1346_v54 = vsel %vm687_vm2, %v3655_v52, 0.0 }
 0x575   : > { %v1349_v55 = vsel %vm687_vm2, %v3657_v53, 0.0  ;;  %1347 = vadd.xlane.f32.xlu1 %v1346_v54 }
 0x576   : > { %1350 = vadd.xlane.f32.xlu0 %v1349_v55 }
 0x57f   : > { %v3659_v0 = vpop.eup %3658 }
 0x580   : > { %v3661_v1 = vpop.eup %3660  ;;  %v1355_v2 = vsel %vm687_vm2, %v3659_v0, 0.0 }
 0x581   : > { %v1352_v5 = vsel %vm687_vm2, %v3661_v1, 0.0 }
 0x586   : > { %1466 = vrot.lane.b32.xlu1 %v4280_v13, %s3957_s28 }
 0x58a   : > { %1514 = vrot.lane.b32.xlu1 %v4285_v19, %s3957_s28 }
 0x58c   : > { %1418 = vrot.lane.b32.xlu0 %v4288_v21, %s3957_s28 }
 0x5ab   : > { %1356 = vadd.xlane.f32.xlu0 %v1355_v2 }
 0x5ae   : > { %1353 = vadd.xlane.f32.xlu1 %v1352_v5 }
 0x5bf   : > { %1614 = vrot.lane.b32.xlu1 %v4288_v21, %s3958_s6 }
 0x5c1   : > { %1564 = vrot.lane.b32.xlu0 %v4282_v16, %s3958_s6 }
 0x5c3   : > { %1612 = vrot.lane.b32.xlu1 %v4288_v21, %s3959_s7 }
 0x5c5   : > { %1562 = vrot.lane.b32.xlu0 %v4282_v16, %s3959_s7 }
 0x5c7   : > { %1714 = vrot.lane.b32.xlu1 %v4285_v19, %s3958_s6 }
 0x5c9   : > { %1664 = vrot.lane.b32.xlu0 %v4280_v13, %s3958_s6  ;;  %s4803_s6 = sld [smem:[#allocation27_spill]] }
 0x5cb   : > { %1712 = vrot.lane.b32.xlu1 %v4285_v19, %s3959_s7 }
 0x5cd   : > { %1662 = vrot.lane.b32.xlu0 %v4280_v13, %s3959_s7  ;;  %s562_s7 = scalar_lea.vmem [#allocation11], %s3109_s9 }
 0x5fe   : > { %v1348_v6 = vpop.xlane.xlu1 %1347 }
 0x5ff   : > { %3662 = vrcp.f32 %v1348_v6  ;;  %v1351_v7 = vpop.xlane.xlu0 %1350 }
 0x600   : > { %3664 = vrcp.f32 %v1351_v7 }
 0x602   : > { %v1467_v11 = vpop.permute.xlu1 %1466 }
 0x603   : > { %v1419_v9 = vpop.permute.xlu0 %1418  ;;  %v1472_v23 = vsel %vm934_vm3, %v1467_v11, 0 }
 0x604   : > { %v1424_v10 = vsel %vm934_vm3, %v1419_v9, 0 }
 0x605   : > { %3354 = vmatpush3.bf16.msra.mxu0 %v1424_v10 }
 0x606   : > { %3365 = vmatprep.subr.bf16.mxu0 %v3951_v8  ;;  %v1515_v18 = vpop.permute.xlu1 %1514 }
 0x607   : > { %v1520_v24 = vsel %vm934_vm3, %v1515_v18, 0 }
 0x60c   : > { %v3663_v12 = vpop.eup %3662 }
 0x60d   : > { %v3665_v14 = vpop.eup %3664  ;;  %v1362_v15 = vmul.f32 %v3663_v12, %v3655_v52 }
 0x60e   : > { %v1363_v17 = vmul.f32 %v3665_v14, %v3657_v53 }
 0x60f   : > { %v1366_v20 = vpack.c.bf16 %v1362_v15, %v1362_v15 }
 0x610   : > { %v1367_v22 = vpack.c.bf16 %v1363_v17, %v1363_v17 }
 0x611   : > { %3350 = vmatmul.mubr.msk.bf16.vlgmr.msra.gmra.mxu1 %vm687_vm2, %v1366_v20 }
 0x612   : > { %3356 = vmatmul.mubr.msk.bf16.vlgmr.msra.gmra.mxu0 %vm687_vm2, %v1367_v22  ;;  %3360 = vmatpush3.bf16.msra.mxu1 %v1472_v23 }
 0x613   : > { %3366 = vmatpush3.bf16.msra.mxu0 %v1520_v24  ;;  %3367 = vmatprep.mubr.msk.bf16.mxu0 %vm3952_vm1, %v3951_v8 }
 0x614   : > { %3377 = vmatprep.subr.bf16.mxu0 %v3951_v8  ;;  %3361 = vmatprep.mubr.msk.bf16.mxu1 %vm3952_vm1, %v3951_v8 }
 0x615   : > { %3371 = vmatprep.subr.bf16.mxu1 %v3951_v8 }
 0x634   : > { %v1357_v25 = vpop.xlane.xlu0 %1356 }
 0x635   : > { %3666 = vrcp.f32 %v1357_v25 }
 0x637   : > { %v1354_v26 = vpop.xlane.xlu1 %1353 }
 0x638   : > { %3668 = vrcp.f32 %v1354_v26  ;;  %v1565_v29 = vpop.permute.xlu0 %1564 }
 0x639   : > { %v1570_v40 = vsel %vm687_vm2, %v1565_v29, 0 }
 0x63b   : > { %v1615_v27 = vpop.permute.xlu1 %1614 }
 0x63c   : > { %v1620_v37 = vsel %vm687_vm2, %v1615_v27, 0  ;;  %v1563_v39 = vpop.permute.xlu0 %1562 }
 0x63f   : > { %v1613_v35 = vpop.permute.xlu1 %1612 }
 0x640   : > { %v1665_v43 = vpop.permute.xlu0 %1664 }
 0x641   : > { %v1670_v45 = vsel %vm687_vm2, %v1665_v43, 0 }
 0x642   : > { %v3667_v28 = vpop.eup %3666 }
 0x643   : > { %v1365_v31 = vmul.f32 %v3667_v28, %v3659_v0  ;;  %v1715_v42 = vpop.permute.xlu1 %1714 }
 0x644   : > { %v1720_v44 = vsel %vm687_vm2, %v1715_v42, 0  ;;  %v1663_v47 = vpop.permute.xlu0 %1662 }
 0x645   : > { %v3669_v32 = vpop.eup %3668  ;;  %v1369_v33 = vpack.c.bf16 %v1365_v31, %v1365_v31 }
 0x646   : > { %v1364_v36 = vmul.f32 %v3669_v32, %v3661_v1 }
 0x647   : > { %3368 = vmatmul.mubr.msk.bf16.vlgmr.msra.gmra.mxu0 %vm687_vm2, %v1369_v33  ;;  %v1713_v46 = vpop.permute.xlu1 %1712 }
 0x648   : > { %3378 = vmatpush3.bf16.xpose.msra.mxu0 %v1620_v37  ;;  %v1368_v38 = vpack.c.bf16 %v1364_v36, %v1364_v36  ;;  %3379 = vmatprep.mubr.msk.bf16.mxu0 %vm3952_vm1, %v3951_v8 }
 0x649   : > { %3389 = vmatprep.subr.bf16.mxu0 %v3951_v8 }
 0x64a   : > { %3362 = vmatmul.mubr.msk.bf16.vlgmr.msra.gmra.mxu1 %vm687_vm2, %v1368_v38 }
 0x64b   : > { %3372 = vmatpush3.bf16.xpose.msra.mxu1 %v1570_v40  ;;  %3373 = vmatprep.mubr.msk.bf16.mxu1 %vm3952_vm1, %v3951_v8 }
 0x64c   : > { %3383 = vmatprep.subr.bf16.mxu1 %v3951_v8 }
 0x64f   : > { %3380 = vmatmul.mubr.msk.bf16.vlgmr.msra.gmra.mxu0 %vm687_vm2, %v1613_v35 }
 0x650   : > { %3390 = vmatpush3.bf16.xpose.msra.mxu0 %v1720_v44  ;;  %3391 = vmatprep.mubr.msk.bf16.mxu0 %vm3952_vm1, %v3951_v8 }
 0x651   : > { %3401 = vmatprep.subr.bf16.mxu0 %v3951_v8 }
 0x652   : > { %3374 = vmatmul.mubr.msk.bf16.vlgmr.msra.gmra.mxu1 %vm687_vm2, %v1563_v39 }
 0x653   : > { %3384 = vmatpush3.bf16.xpose.msra.mxu1 %v1670_v45  ;;  %3385 = vmatprep.mubr.msk.bf16.mxu1 %vm3952_vm1, %v3951_v8 }
 0x654   : > { %3395 = vmatprep.subr.bf16.mxu1 %v3951_v8 }
 0x657   : > { %3392 = vmatmul.mubr.msk.bf16.vlgmr.msra.gmra.mxu0 %vm687_vm2, %v1713_v46 }
 0x658   : > { %3403 = vmatprep.mubr.msk.bf16.mxu0 %vm3952_vm1, %v3951_v8 }
 0x65a   : > { %3386 = vmatmul.mubr.msk.bf16.vlgmr.msra.gmra.mxu1 %vm687_vm2, %v1663_v47 }
 0x65b   : > { %3397 = vmatprep.mubr.msk.bf16.mxu1 %vm3952_vm1, %v3951_v8 }
 0x6d1   : > { %v4464_v49 = vpop.f32.mrf.mxu1 }
 0x6d2   : > { %v4466_v50 = vpop.f32.mrf.mxu0 }
 0x6d3   : > { %v3598_v51 = vpack.i.bf16 %v4466_v50, %v4464_v49  ;;  %v3351_v52 = vpop.f32.mrf.mxu1 }
 0x6d4   : > { %v3357_v53 = vpop.f32.mrf.mxu0 }
 0x6d5   : > { %v1415_v54 = vpop.f32.mrf.mxu1 }
 0x6d6   : > { %v1463_v55 = vpop.f32.mrf.mxu0 }
 0x6d7   : > { %v3352_v56 = vpop.f32.mrf.mxu1 }
 0x6d8   : > { %v3358_v57 = vpop.f32.mrf.mxu0 }
 0x707   : > { %v4470_v58 = vpop.f32.mrf.mxu0 }
 0x709   : > { %v3369_v60 = vpop.f32.mrf.mxu0 }
 0x70a   : > { %v4472_v61 = vpop.f32.mrf.mxu1 }
 0x70b   : > { %v3603_v63 = vpack.i.bf16 %v4470_v58, %v4472_v61  ;;  %v1559_v0 = vpop.f32.mrf.mxu0 }
 0x70c   : > { %v3363_v1 = vpop.f32.mrf.mxu1 }
 0x70d   : > { %v3370_v2 = vpop.f32.mrf.mxu0 }
 0x70e   : > { %v1511_v5 = vpop.f32.mrf.mxu1 }
 0x70f   : > { %v1656_v6 = vpop.f32.mrf.mxu0 }
 0x710   : > { %v1657_v7 = vadd.f32 %v4321_v34, %v1656_v6  ;;  %v3364_v9 = vpop.f32.mrf.mxu1 }
 0x711   : > { %v3381_v10 = vpop.f32.mrf.mxu0 }
 0x712   : > { %v1765_v11 = vsel %vm687_vm2, %v1657_v7, -inf  ;;  %v1606_v12 = vpop.f32.mrf.mxu1 }
 0x713   : > { %1766 = vmax.xlane.f32.xlu1 %v1765_v11  ;;  %v1607_v14 = vadd.f32 %v4317_v30, %v1606_v12  ;;  %v1659_v15 = vpop.f32.mrf.mxu0 }
 0x714   : > { %v3375_v17 = vpop.f32.mrf.mxu1 }
 0x715   : > { %v3382_v18 = vpop.f32.mrf.mxu0  ;;  %v1762_v20 = vsel %vm687_vm2, %v1607_v14, -inf }
 0x716   : > { %1763 = vmax.xlane.f32.xlu0 %v1762_v20  ;;  %v1609_v22 = vpop.f32.mrf.mxu1 }
 0x717   : > { %v1756_v23 = vpop.f32.mrf.mxu0 }
 0x718   : > { %v3376_v24 = vpop.f32.mrf.mxu1  ;;  %v1757_v31 = vadd.f32 %v4331_v48, %v1756_v23 }
 0x719   : > { %v3393_v25 = vpop.f32.mrf.mxu0 }
 0x71a   : > { %v1706_v26 = vpop.f32.mrf.mxu1  ;;  %v1771_v37 = vsel %vm687_vm2, %v1757_v31, -inf }
 0x71b   : > { %v1707_v27 = vadd.f32 %v4326_v41, %v1706_v26  ;;  %v1759_v28 = vpop.f32.mrf.mxu0 }
 0x71c   : > { %v3387_v29 = vpop.f32.mrf.mxu1 }
 0x71d   : > { %v3394_v32 = vpop.f32.mrf.mxu0  ;;  %v1768_v33 = vsel %vm687_vm2, %v1707_v27, -inf }
 0x71e   : > { %1769 = vmax.xlane.f32.xlu0 %v1768_v33  ;;  %v1709_v35 = vpop.f32.mrf.mxu1 }
 0x720   : > { %v3388_v36 = vpop.f32.mrf.mxu1 }
 0x722   : > { %1772 = vmax.xlane.f32.xlu0 %v1771_v37 }
 0x724   : > { %1810 = vrot.lane.b32.xlu1 %v4282_v16, %s3960_s14 }
 0x79c   : > { %v1767_v38 = vpop.xlane.xlu1 %1766 }
 0x79d   : > { %v1775_v39 = vsub.f32 %v1657_v7, %v1767_v38 }
 0x79f   : > { %v1780_v40 = vmul.f32 1.442695, %v1775_v39  ;;  %v1764_v42 = vpop.xlane.xlu0 %1763 }
 0x7a0   : > { %v1811_v43 = vpop.permute.xlu1 %1810  ;;  %v1774_v44 = vsub.f32 %v1607_v14, %v1764_v42 }
 0x7a1   : > { %3670 = vpow2.f32 %v1780_v40  ;;  %v1816_v45 = vsel %vm934_vm3, %v1811_v43, 0 }
 0x7a2   : > { %v1778_v46 = vmul.f32 1.442695, %v1774_v44  ;;  %3396 = vmatpush3.bf16.msra.mxu1 %v1816_v45 }
 0x7a3   : > { %3407 = vmatprep.subr.bf16.mxu1 %v3951_v8 }
 0x7a4   : > { %3672 = vpow2.f32 %v1778_v46 }
 0x7a7   : > { %v1770_v55 = vpop.xlane.xlu0 %1769 }
 0x7a8   : > { %v1776_v0 = vsub.f32 %v1707_v27, %v1770_v55 }
 0x7aa   : > { %v1782_v1 = vmul.f32 1.442695, %v1776_v0 }
 0x7ab   : > { %v1773_v56 = vpop.xlane.xlu0 %1772 }
 0x7ac   : > { %v1777_v57 = vsub.f32 %v1757_v31, %v1773_v56 }
 0x7ae   : > { %v3671_v47 = vpop.eup %3670  ;;  %v1784_v60 = vmul.f32 1.442695, %v1777_v57 }
 0x7af   : > { %v1789_v52 = vsel %vm687_vm2, %v3671_v47, 0.0 }
 0x7b0   : > { %1790 = vadd.xlane.f32.xlu0 %v1789_v52  ;;  %3674 = vpow2.f32 %v1784_v60 }
 0x7b1   : > { %v3673_v53 = vpop.eup %3672  ;;  %3676 = vpow2.f32 %v1782_v1 }
 0x7b2   : > { %v1786_v54 = vsel %vm687_vm2, %v3673_v53, 0.0 }
 0x7b3   : > { %1787 = vadd.xlane.f32.xlu1 %v1786_v54 }
 0x7bd   : > { %v3675_v2 = vpop.eup %3674 }
 0x7be   : > { %v1795_v5 = vsel %vm687_vm2, %v3675_v2, 0.0  ;;  %v3677_v6 = vpop.eup %3676 }
 0x7bf   : > { %v1792_v7 = vsel %vm687_vm2, %v3677_v6, 0.0 }
 0x7c4   : > { %1906 = vrot.lane.b32.xlu1 %v4280_v13, %s3960_s14 }
 0x7c6   : > { %1858 = vrot.lane.b32.xlu0 %v4288_v21, %s3960_s14 }
 0x7c8   : > { %1954 = vrot.lane.b32.xlu1 %v4285_v19, %s3960_s14  ;;  %s4804_s14 = sld [smem:[#allocation22_spill]] }
 0x7ce   : > { %p4806_p5 = scmp.ne.s32.totalorder %s4804_s14, 0 }
 0x7e5   : > { %1796 = vadd.xlane.f32.xlu0 %v1795_v5 }
 0x7ec   : > { %1793 = vadd.xlane.f32.xlu1 %v1792_v7 }
 0x7fb   : > { %2004 = vrot.lane.b32.xlu0 %v4282_v16, %s3961_s21 }
 0x7fd   : > { %2054 = vrot.lane.b32.xlu1 %v4288_v21, %s3961_s21 }
 0x7ff   : > { %2002 = vrot.lane.b32.xlu0 %v4282_v16, %s3962_s22 }
 0x801   : > { %2052 = vrot.lane.b32.xlu1 %v4288_v21, %s3962_s22 }
 0x803   : > { %2104 = vrot.lane.b32.xlu0 %v4280_v13, %s3961_s21 }
 0x805   : > { %2154 = vrot.lane.b32.xlu1 %v4285_v19, %s3961_s21  ;;  %s3184_s21 = sshll.u32 %s4065_s17, 9  ;;  %s2959_s17 = scalar_lea.sflag [#allocation4], %s4231_s29 }
 0x806   : > { %s4701_s9 = scalar_lea.hbm %s4805_s0, %s3184_s21 }
 0x807   : > { %2102 = vrot.lane.b32.xlu0 %v4280_v13, %s3962_s22 }
 0x809   : > { %2152 = vrot.lane.b32.xlu1 %v4285_v19, %s3962_s22  ;;  %s2972_s22 = sshll.u32 %s562_s7, 4  ;;  %s4703_s22 = int_to_ptr.vmem [resolvable:$true] %s2972_s22 }
 0x80a   : > { %s3864_s25 = scalar_lea.vmem %s4703_s22, 512  ;;  %p3871_p6 = scmp.lt.s32.totalorder %s4703_s22, %s3869_s20 }
 0x80b   : > { %p3865_p0 = scmp.ne.s32.totalorder %s4703_s22, %s3864_s25 }
 0x80d   : > { %p3866_p1 = pnand %p3865_p0, %p4806_p5 }
 0x80f   : > { %p3867_p9 = pneg %p3866_p1 }
 0x839   : > { %v1791_v9 = vpop.xlane.xlu0 %1790 }
 0x83a   : > { %3678 = vrcp.f32 %v1791_v9 }
 0x83c   : > { %v1788_v10 = vpop.xlane.xlu1 %1787 }
 0x83d   : > { %3680 = vrcp.f32 %v1788_v10  ;;  %v1859_v11 = vpop.permute.xlu0 %1858 }
 0x83e   : > { %v1864_v12 = vsel %vm934_vm3, %v1859_v11, 0 }
 0x83f   : > { %3402 = vmatpush3.bf16.msra.mxu0 %v1864_v12 }
 0x840   : > { %3413 = vmatprep.subr.bf16.mxu0 %v3951_v8  ;;  %v1907_v14 = vpop.permute.xlu1 %1906 }
 0x841   : > { %v1912_v26 = vsel %vm934_vm3, %v1907_v14, 0 }
 0x844   : > { %v1955_v18 = vpop.permute.xlu1 %1954 }
 0x845   : > { %v1960_v24 = vsel %vm934_vm3, %v1955_v18, 0 }
 0x847   : > { %v3679_v15 = vpop.eup %3678 }
 0x848   : > { %v1803_v17 = vmul.f32 %v3679_v15, %v3671_v47 }
 0x84a   : > { %v3681_v20 = vpop.eup %3680  ;;  %v1807_v22 = vpack.c.bf16 %v1803_v17, %v1803_v17 }
 0x84b   : > { %v1802_v23 = vmul.f32 %v3681_v20, %v3673_v53 }
 0x84c   : > { %3404 = vmatmul.mubr.msk.bf16.vlgmr.msra.gmra.mxu0 %vm687_vm2, %v1807_v22 }
 0x84d   : > { %3414 = vmatpush3.bf16.msra.mxu0 %v1960_v24  ;;  %v1806_v25 = vpack.c.bf16 %v1802_v23, %v1802_v23  ;;  %3415 = vmatprep.mubr.msk.bf16.mxu0 %vm3952_vm1, %v3951_v8 }
 0x84e   : > { %3425 = vmatprep.subr.bf16.mxu0 %v3951_v8 }
 0x84f   : > { %3398 = vmatmul.mubr.msk.bf16.vlgmr.msra.gmra.mxu1 %vm687_vm2, %v1806_v25 }
 0x850   : > { %3408 = vmatpush3.bf16.msra.mxu1 %v1912_v26  ;;  %3409 = vmatprep.mubr.msk.bf16.mxu1 %vm3952_vm1, %v3951_v8 }
 0x851   : > { %3419 = vmatprep.subr.bf16.mxu1 %v3951_v8 }
 0x86e   : > { %v1797_v27 = vpop.xlane.xlu0 %1796 }
 0x86f   : > { %3682 = vrcp.f32 %v1797_v27 }
 0x872   : > { %v2005_v36 = vpop.permute.xlu0 %2004 }
 0x873   : > { %v2010_v44 = vsel %vm687_vm2, %v2005_v36, 0 }
 0x875   : > { %v1794_v28 = vpop.xlane.xlu1 %1793 }
 0x876   : > { %3684 = vrcp.f32 %v1794_v28  ;;  %v2003_v43 = vpop.permute.xlu0 %2002 }
 0x879   : > { %v2055_v29 = vpop.permute.xlu1 %2054 }
 0x87a   : > { %v2060_v37 = vsel %vm687_vm2, %v2055_v29, 0  ;;  %v2105_v46 = vpop.permute.xlu0 %2104 }
 0x87b   : > { %v2110_v47 = vsel %vm687_vm2, %v2105_v46, 0 }
 0x87c   : > { %v3683_v31 = vpop.eup %3682 }
 0x87d   : > { %v1805_v32 = vmul.f32 %v3683_v31, %v3675_v2  ;;  %v2053_v35 = vpop.permute.xlu1 %2052 }
 0x87e   : > { %v2103_v53 = vpop.permute.xlu0 %2102 }
 0x87f   : > { %v1809_v33 = vpack.c.bf16 %v1805_v32, %v1805_v32 }
 0x881   : > { %3416 = vmatmul.mubr.msk.bf16.vlgmr.msra.gmra.mxu0 %vm687_vm2, %v1809_v33  ;;  %v2155_v40 = vpop.permute.xlu1 %2154 }
 0x882   : > { %3426 = vmatpush3.bf16.xpose.msra.mxu0 %v2060_v37  ;;  %3427 = vmatprep.mubr.msk.bf16.mxu0 %vm3952_vm1, %v3951_v8  ;;  %v2160_v45 = vsel %vm687_vm2, %v2155_v40, 0 }
 0x883   : > { %v3685_v38 = vpop.eup %3684  ;;  %3437 = vmatprep.subr.bf16.mxu0 %v3951_v8 }
 0x884   : > { %v1804_v39 = vmul.f32 %v3685_v38, %v3677_v6 }
 0x885   : > { %v2153_v52 = vpop.permute.xlu1 %2152 }
 0x886   : > { %v1808_v42 = vpack.c.bf16 %v1804_v39, %v1804_v39 }
 0x888   : > { %3410 = vmatmul.mubr.msk.bf16.vlgmr.msra.gmra.mxu1 %vm687_vm2, %v1808_v42 }
 0x889   : > { %3420 = vmatpush3.bf16.xpose.msra.mxu1 %v2010_v44  ;;  %3428 = vmatmul.mubr.msk.bf16.vlgmr.msra.gmra.mxu0 %vm687_vm2, %v2053_v35 }
 0x88a   : > { %3438 = vmatpush3.bf16.xpose.msra.mxu0 %v2160_v45  ;;  %3421 = vmatprep.mubr.msk.bf16.mxu1 %vm3952_vm1, %v3951_v8 }
 0x88b   : > { %3431 = vmatprep.subr.bf16.mxu1 %v3951_v8  ;;  %3439 = vmatprep.mubr.msk.bf16.mxu0 %vm3952_vm1, %v3951_v8 }
 0x88c   : > { %3449 = vmatprep.subr.bf16.mxu0 %v3951_v8 }
 0x890   : > { %3422 = vmatmul.mubr.msk.bf16.vlgmr.msra.gmra.mxu1 %vm687_vm2, %v2003_v43 }
 0x891   : > { %3432 = vmatpush3.bf16.xpose.msra.mxu1 %v2110_v47  ;;  %3440 = vmatmul.mubr.msk.bf16.vlgmr.msra.gmra.mxu0 %vm687_vm2, %v2153_v52 }
 0x892   : > { %3433 = vmatprep.mubr.msk.bf16.mxu1 %vm3952_vm1, %v3951_v8  ;;  %3443 = vmatprep.subr.bf16.mxu1 %v3951_v8 }
 0x893   : > { %3451 = vmatprep.mubr.msk.bf16.mxu0 %vm3952_vm1, %v3951_v8 }
 0x898   : > { %3434 = vmatmul.mubr.msk.bf16.vlgmr.msra.gmra.mxu1 %vm687_vm2, %v2103_v53 }
 0x899   : > { %3445 = vmatprep.mubr.msk.bf16.mxu1 %vm3952_vm1, %v3951_v8 }
 0x90c   : > { %v4540_v54 = vpop.f32.mrf.mxu0 }
 0x90e   : > { %v3405_v55 = vpop.f32.mrf.mxu0 }
 0x90f   : > { %v4542_v56 = vpop.f32.mrf.mxu1 }
 0x910   : > { %v3608_v57 = vpack.i.bf16 %v4540_v54, %v4542_v56  ;;  %v1903_v60 = vpop.f32.mrf.mxu0 }
 0x911   : > { %v3399_v0 = vpop.f32.mrf.mxu1 }
 0x912   : > { %v3406_v1 = vpop.f32.mrf.mxu0 }
 0x913   : > { %v1855_v2 = vpop.f32.mrf.mxu1 }
 0x915   : > { %v3400_v5 = vpop.f32.mrf.mxu1 }
 0x941   : > { %v4546_v6 = vpop.f32.mrf.mxu0 }
 0x943   : > { %v3417_v7 = vpop.f32.mrf.mxu0 }
 0x945   : > { %v1999_v9 = vpop.f32.mrf.mxu0 }
 0x947   : > { %v3418_v10 = vpop.f32.mrf.mxu0 }
 0x948   : > { %v4548_v11 = vpop.f32.mrf.mxu1 }
 0x949   : > { %v3613_v12 = vpack.i.bf16 %v4546_v6, %v4548_v11  ;;  %v2096_v14 = vpop.f32.mrf.mxu0 }
 0x94a   : > { %v2097_v15 = vadd.f32 %v4321_v34, %v2096_v14  ;;  %v3411_v17 = vpop.f32.mrf.mxu1 }
 0x94b   : > { %v3429_v18 = vpop.f32.mrf.mxu0 }
 0x94c   : > { %v1951_v20 = vpop.f32.mrf.mxu1  ;;  %v2205_v22 = vsel %vm687_vm2, %v2097_v15, -inf }
 0x94d   : > { %2206 = vmax.xlane.f32.xlu1 %v2205_v22  ;;  %v2099_v23 = vpop.f32.mrf.mxu0 }
 0x94e   : > { %v3412_v24 = vpop.f32.mrf.mxu1 }
 0x94f   : > { %v3430_v25 = vpop.f32.mrf.mxu0 }
 0x950   : > { %v2046_v26 = vpop.f32.mrf.mxu1 }
 0x951   : > { %v2047_v27 = vadd.f32 %v4317_v30, %v2046_v26  ;;  %v2196_v28 = vpop.f32.mrf.mxu0 }
 0x952   : > { %v3423_v29 = vpop.f32.mrf.mxu1  ;;  %v2197_v40 = vadd.f32 %v4331_v48, %v2196_v28 }
 0x953   : > { %v3441_v31 = vpop.f32.mrf.mxu0  ;;  %v2202_v32 = vsel %vm687_vm2, %v2047_v27, -inf  ;;  %v3630_v29 = vld [vmem:[%s4752_s4 + $0x8] sm:$0xff]  }
 0x954   : > { %2203 = vmax.xlane.f32.xlu0 %v2202_v32  ;;  %v2049_v33 = vpop.f32.mrf.mxu1  ;;  %v2211_v44 = vsel %vm687_vm2, %v2197_v40, -inf }
 0x955   : > { %v2199_v34 = vpop.f32.mrf.mxu0 }
 0x956   : > { %v3424_v35 = vpop.f32.mrf.mxu1 }
 0x957   : > { %v3442_v36 = vpop.f32.mrf.mxu0 }
 0x958   : > { %v2146_v37 = vpop.f32.mrf.mxu1 }
 0x959   : > { %v2147_v38 = vadd.f32 %v4326_v41, %v2146_v37 }
 0x95a   : > { %v3435_v39 = vpop.f32.mrf.mxu1 }
 0x95b   : > { %v2208_v42 = vsel %vm687_vm2, %v2147_v38, -inf }
 0x95c   : > { %2209 = vmax.xlane.f32.xlu0 %v2208_v42  ;;  %v2149_v30 = vpop.f32.mrf.mxu1 }
 0x95e   : > { %2250 = vrot.lane.b32.xlu1 %v4282_v16, %s3963_s15  ;;  %v3436_v43 = vpop.f32.mrf.mxu1 }
 0x960   : > { %2212 = vmax.xlane.f32.xlu0 %v2211_v44 }
 0x9d6   : > { %v2207_v45 = vpop.xlane.xlu1 %2206 }
 0x9d7   : > { %v2215_v46 = vsub.f32 %v2097_v15, %v2207_v45 }
 0x9d9   : > { %v2220_v47 = vmul.f32 1.442695, %v2215_v46 }
 0x9da   : > { %v2251_v52 = vpop.permute.xlu1 %2250 }
 0x9db   : > { %3686 = vpow2.f32 %v2220_v47  ;;  %v2256_v41 = vsel %vm934_vm3, %v2251_v52, 0 }
 0x9dc   : > { %3444 = vmatpush3.bf16.msra.mxu1 %v2256_v41 }
 0x9dd   : > { %v2204_v48 = vpop.xlane.xlu0 %2203  ;;  %3455 = vmatprep.subr.bf16.mxu1 %v3951_v8 }
 0x9de   : > { %v2214_v53 = vsub.f32 %v2047_v27, %v2204_v48 }
 0x9e0   : > { %v2218_v55 = vmul.f32 1.442695, %v2214_v53 }
 0x9e2   : > { %3688 = vpow2.f32 %v2218_v55 }
 0x9e5   : > { %v2210_v60 = vpop.xlane.xlu0 %2209 }
 0x9e6   : > { %v2216_v16 = vsub.f32 %v2147_v38, %v2210_v60 }
 0x9e8   : > { %v3687_v0 = vpop.eup %3686  ;;  %v2222_v1 = vmul.f32 1.442695, %v2216_v16 }
 0x9e9   : > { %v2229_v2 = vsel %vm687_vm2, %v3687_v0, 0.0  ;;  %v2213_v5 = vpop.xlane.xlu0 %2212 }
 0x9ea   : > { %3690 = vpow2.f32 %v2222_v1  ;;  %2230 = vadd.xlane.f32.xlu0 %v2229_v2  ;;  %v2217_v7 = vsub.f32 %v2197_v40, %v2213_v5 }
 0x9ec   : > { %v2224_v9 = vmul.f32 1.442695, %v2217_v7 }
 0x9ee   : > { %3692 = vpow2.f32 %v2224_v9 }
 0x9ef   : > { %v3689_v10 = vpop.eup %3688 }
 0x9f0   : > { %v2226_v14 = vsel %vm687_vm2, %v3689_v10, 0.0 }
 0x9f1   : > { %2227 = vadd.xlane.f32.xlu1 %v2226_v14 }
 0x9f7   : > { %v3691_v15 = vpop.eup %3690 }
 0x9f8   : > { %v2232_v17 = vsel %vm687_vm2, %v3691_v15, 0.0 }
 0x9f9   : > { %2233 = vadd.xlane.f32.xlu1 %v2232_v17 }
 0x9fb   : > { %v3693_v18 = vpop.eup %3692 }
 0x9fc   : > { %v2235_v20 = vsel %vm687_vm2, %v3693_v18, 0.0 }
 0x9fd   : > { %2236 = vadd.xlane.f32.xlu0 %v2235_v20 }
 0xa0a   : > { %2346 = vrot.lane.b32.xlu1 %v4280_v13, %s3963_s15 }
 0xa0e   : > { %2394 = vrot.lane.b32.xlu1 %v4285_v19, %s3963_s15 }
 0xa12   : > { %3604 = vrot.lane.b32.xlu1 %v3603_v63, %s3964_s26 }
 0xa13   : > { %2298 = vrot.lane.b32.xlu0 %v4288_v21, %s3963_s15 }
 0xa16   : > { %3614 = vrot.lane.b32.xlu1 %v3613_v12, %s3965_s19 }
 0xa17   : > { %3599 = vrot.lane.b32.xlu0 %v3598_v51, %s3964_s26 }
 0xa1b   : > { %3609 = vrot.lane.b32.xlu0 %v3608_v57, %s3965_s19 }
 0xa73   : > { %v2231_v13 = vpop.xlane.xlu0 %2230 }
 0xa74   : > { %3694 = vrcp.f32 %v2231_v13 }
 0xa7a   : > { %v2228_v19 = vpop.xlane.xlu1 %2227 }
 0xa7b   : > { %3696 = vrcp.f32 %v2228_v19 }
 0xa81   : > { %v3695_v21 = vpop.eup %3694 }
 0xa82   : > { %v2234_v58 = vpop.xlane.xlu1 %2233  ;;  %v2243_v12 = vmul.f32 %v3695_v21, %v3687_v0 }
 0xa83   : > { %3698 = vrcp.f32 %v2234_v58 }
 0xa84   : > { %v2247_v56 = vpack.c.bf16 %v2243_v12, %v2243_v12 }
 0xa86   : > { %v2347_v61 = vpop.permute.xlu1 %2346  ;;  %v2237_v63 = vpop.xlane.xlu0 %2236 }
 0xa87   : > { %3700 = vrcp.f32 %v2237_v63  ;;  %v2352_v54 = vsel %vm934_vm3, %v2347_v61, 0 }
 0xa88   : > { %v3697_v6 = vpop.eup %3696 }
 0xa89   : > { %v2242_v11 = vmul.f32 %v3697_v6, %v3689_v10 }
 0xa8a   : > { %v2299_v22 = vpop.permute.xlu0 %2298  ;;  %v2395_v51 = vpop.permute.xlu1 %2394 }
 0xa8b   : > { %v2304_v49 = vsel %vm934_vm3, %v2299_v22, 0  ;;  %v2246_v50 = vpack.c.bf16 %v2242_v11, %v2242_v11  ;;  %v2400_v57 = vsel %vm934_vm3, %v2395_v51, 0 }
 0xa8c   : > { %3450 = vmatpush3.bf16.msra.mxu0 %v2304_v49 }
 0xa8d   : > { %3446 = vmatmul.mubr.msk.bf16.vlgmr.msra.gmra.mxu1 %vm687_vm2, %v2246_v50  ;;  %3461 = vmatprep.subr.bf16.mxu0 %v3951_v8 }
 0xa8e   : > { %3456 = vmatpush3.bf16.msra.mxu1 %v2352_v54  ;;  %3457 = vmatprep.mubr.msk.bf16.mxu1 %vm3952_vm1, %v3951_v8  ;;  %v3600_v41 = vpop.permute.xlu0 %3599  ;;  %v3605_v0 = vpop.permute.xlu1 %3604 }
 0xa8f   : > { %3452 = vmatmul.mubr.msk.bf16.vlgmr.msra.gmra.mxu0 %vm687_vm2, %v2247_v56  ;;  %3467 = vmatprep.subr.bf16.mxu1 %v3630_v29  ;;  %v3602_v53 = vunpack.i.h.bf16 %v3600_v41  ;;  %v3601_v55 = vunpack.i.l.bf16 %v3600_v41  ;;  %v3607_v13 = vunpack.i.h.bf16 %v3605_v0  ;;  %v3606_v19 = vunpack.i.l.bf16 %v3605_v0 }
 0xa90   : > { %v3699_v23 = vpop.eup %3698  ;;  %3462 = vmatpush3.bf16.msra.mxu0 %v2400_v57  ;;  %3463 = vmatprep.mubr.msk.bf16.mxu0 %vm3952_vm1, %v3951_v8  ;;  %v3631_v8 = vld [vmem:[%s4752_s4] sm:$0xff]  }
 0xa91   : > { %v2244_v24 = vmul.f32 %v3699_v23, %v3691_v15  ;;  %v2491_v2 = vsel %vm687_vm2, %v4394_v62, %v3602_v53  ;;  %v2490_v5 = vsel %vm687_vm2, %v4392_v59, %v3601_v55  ;;  %v2493_v59 = vsel %vm687_vm2, %v4398_v4, %v3607_v13  ;;  %v3726_v23 = vld [vmem:[%s4237_s23] sm:$0xff] }
 0xa92   : > { %v3610_v48 = vpop.permute.xlu0 %3609  ;;  %v3615_v20 = vpop.permute.xlu1 %3614  ;;  %v2492_v61 = vsel %vm687_vm2, %v4396_v3, %v3606_v19  ;;  %v3156_v3 = vld [vmem:[%s4753_s5] ss:$0 sm:$0xff] }
 0xa93   : > { %v2248_v26 = vpack.c.bf16 %v2244_v24, %v2244_v24  ;;  %v3612_v60 = vunpack.i.h.bf16 %v3610_v48  ;;  %v3611_v16 = vunpack.i.l.bf16 %v3610_v48  ;;  %v3617_v62 = vunpack.i.h.bf16 %v3615_v20 }
 0xa94   : > { %v3701_v25 = vpop.eup %3700  ;;  %v3616_v58 = vunpack.i.l.bf16 %v3615_v20 }
 0xa95   : > { %3458 = vmatmul.mubr.msk.bf16.vlgmr.msra.gmra.mxu1 %vm687_vm2, %v2248_v26  ;;  %v2245_v27 = vmul.f32 %v3701_v25, %v3693_v18  ;;  %v2495_v10 = vsel %vm2494_vm4, %v2490_v5, %v3611_v16  ;;  %v2496_v14 = vsel %vm2494_vm4, %v2491_v2, %v3612_v60  ;;  %v2498_v12 = vsel %vm2494_vm4, %v2493_v59, %v3617_v62  ;;  %v3632_v5 = vld [vmem:[%s4756_s8 + $0x8] sm:$0xff]  }
 0xa96   : > { %3468 = vmatpush3.bf16.msra.mxu1 %v3630_v29  ;;  %v2497_v11 = vsel %vm2494_vm4, %v2492_v61, %v3616_v58  ;;  %v3727_v29 = vld [vmem:[%s4237_s23 + $0x10] sm:$0xff]  ;;  %3475 = vmatprep.subr.bf16.mxu0 %v3632_v5 }
 0xa97   : > { %v2249_v28 = vpack.c.bf16 %v2245_v27, %v2245_v27  ;;  %3469 = vmatprep.subr.bf16.mxu1 %v3631_v8 }
 0xa99   : > { %3464 = vmatmul.mubr.msk.bf16.vlgmr.msra.gmra.mxu0 %vm687_vm2, %v2249_v28 }
 0xa9a   : > { %3470 = vmatpush3.bf16.msra.mxu1 %v3631_v8  ;;  %3476 = vmatpush3.bf16.msra.mxu0 %v3632_v5 }
 0xb4d   : > { %v2292_v31 = vpop.f32.mrf.mxu1 }
 0xb4f   : > { %v3447_v32 = vpop.f32.mrf.mxu1  ;;  %v2340_v33 = vpop.f32.mrf.mxu0 }
 0xb50   : > { %v3618_v34 = vpack.i.bf16 %v2340_v33, %v2292_v31  ;;  %v3728_v32 = vld [vmem:[%s4237_s23 + $0x8] sm:$0xff] }
 0xb51   : > { %v2295_v35 = vpop.f32.mrf.mxu1  ;;  %v3453_v36 = vpop.f32.mrf.mxu0 }
 0xb52   : > { %3619 = vrot.lane.b32.xlu0 %v3618_v34, %s3966_s24  ;;  %v3729_v35 = vld [vmem:[%s4237_s23 + $0x18] sm:$0xff] }
 0xb53   : > { %v3448_v37 = vpop.f32.mrf.mxu1  ;;  %v2343_v38 = vpop.f32.mrf.mxu0 }
 0xb55   : > { %v3454_v39 = vpop.f32.mrf.mxu0  ;;  %v2388_v40 = vpop.f32.mrf.mxu1 }
 0xb57   : > { %v3459_v42 = vpop.f32.mrf.mxu1 }
 0xb59   : > { %v2391_v30 = vpop.f32.mrf.mxu1  ;;  %v2436_v43 = vpop.f32.mrf.mxu0 }
 0xb5a   : > { %v3623_v44 = vpack.i.bf16 %v2436_v43, %v2388_v40 }
 0xb5b   : > { %v3460_v45 = vpop.f32.mrf.mxu1  ;;  %v3465_v46 = vpop.f32.mrf.mxu0 }
 0xb5c   : > { %3624 = vrot.lane.b32.xlu1 %v3623_v44, %s3966_s24  ;;  %s3870_s24 = scalar_lea.vmem %s3869_s20, 1024 }
 0xb5d   : > { %v2439_v47 = vpop.f32.mrf.mxu0  ;;  %p3872_p7 = scmp.lt.s32.totalorder %s3870_s24, %s3864_s25 }
 0xb5f   : > { %v3466_v52 = vpop.f32.mrf.mxu0  ;;  %p3873_p2 = por %p3872_p7, %p3871_p6 }
 0xb61   : > { %p3874_p3 = pnand %p3873_p2, %p3867_p9 }
 0xbc4   : > { %v3620_v1 = vpop.permute.xlu0 %3619 }
 0xbc5   : > { %v3622_v7 = vunpack.i.h.bf16 %v3620_v1  ;;  %v3621_v9 = vunpack.i.l.bf16 %v3620_v1 }
 0xbc7   : > { %v2500_v15 = vsel %vm2499_vm5, %v2495_v10, %v3621_v9  ;;  %v2501_v17 = vsel %vm2499_vm5, %v2496_v14, %v3622_v7  ;;  %v3633_v7 = vld [vmem:[%s4756_s8] sm:$0xff]  }
 0xbc8   : > { %v2504_v18 = vpack.c.bf16 %v2501_v17, %v2500_v15  ;;  %3477 = vmatprep.subr.bf16.mxu0 %v3633_v7 }
 0xbc9   : > { %3478 = vmatpush3.bf16.msra.mxu0 %v3633_v7 }
 0xbca   : > { %3471 = vmatprep.mubr.msk.bf16.mxu1 %vm624_vm0, %v2504_v18 }
 0xbce   : > { %v3625_v21 = vpop.permute.xlu1 %3624 }
 0xbcf   : > { %v3627_v63 = vunpack.i.h.bf16 %v3625_v21  ;;  %v3626_v6 = vunpack.i.l.bf16 %v3625_v21 }
 0xbd1   : > { %v2503_v22 = vsel %vm2499_vm5, %v2498_v12, %v3627_v63  ;;  %v2502_v49 = vsel %vm2499_vm5, %v2497_v11, %v3626_v6  ;;  %v3161_v63 = vld [vmem:[#allocation7] ss:$0 sm:$0xff] }
 0xbd2   : > { %v2505_v50 = vpack.c.bf16 %v2503_v22, %v2502_v49 }
 0xbd4   : > { %3472 = vmatmul.mubr.msk.bf16.vlgmr.msra.gmra.mxu1 %vm624_vm0, %v2505_v50  ;;  %v3162_v50 = vld [vmem:[#allocation8] ss:$0 sm:$0xff] }
 0xc94   : > { %v3473_v4 = vpop.f32.mrf.mxu1 }
 0xc95   : > { %v2578_v54 = vadd.f32 %v3473_v4, %v3156_v3 }
 0xc96   : > { %v2569_v51 = vpop.f32.mrf.mxu1 }
 0xc97   : > { %v2570_v56 = vadd.f32 %v3156_v3, %v2569_v51  ;;  %v2586_v31 = vadd.f32 %v3727_v29, %v2578_v54  ;;  %v3635_v29 = vld [vmem:[%s4758_s10 + $0x10] sm:$0xff]  }
 0xc98   : > { %v3474_v57 = vpop.f32.mrf.mxu1 }
 0xc99   : > { %v2584_v24 = vadd.f32 %v3726_v23, %v2570_v56  ;;  %v2581_v26 = vadd.f32 %v3474_v57, %v3156_v3  ;;  %v2596_v8 = vsel %vm624_vm0, %v2586_v31, 0.0 }
 0xc9a   : > { %v2572_v25 = vpop.f32.mrf.mxu1 }
 0xc9b   : > { %v2573_v27 = vadd.f32 %v3156_v3, %v2572_v25  ;;  %v2590_v28 = vsel %vm624_vm0, %v2584_v24, 0.0  ;;  %v2587_v36 = vadd.f32 %v3729_v35, %v2581_v26 }
 0xc9c   : > { %2591 = vadd.xlane.f32.xlu0 %v2590_v28  ;;  %v3634_v28 = vld [vmem:[%s4758_s10 + $0x18] sm:$0xff]  }
 0xc9d   : > { %v2585_v33 = vadd.f32 %v3728_v32, %v2573_v27  ;;  %v2599_v37 = vsel %vm624_vm0, %v2587_v36, 0.0  ;;  %3483 = vmatprep.subr.bf16.mxu1 %v3634_v28  ;;  %v3637_v32 = vld [vmem:[%s4758_s10] sm:$0xff]  }
 0xc9e   : > { %3484 = vmatpush3.bf16.msra.mxu1 %v3634_v28 }
 0xc9f   : > { %v2593_v34 = vsel %vm624_vm0, %v2585_v33, 0.0  ;;  %3485 = vmatprep.subr.bf16.mxu1 %v3635_v29 }
 0xca0   : > { %2594 = vadd.xlane.f32.xlu1 %v2593_v34  ;;  %2597 = vadd.xlane.f32.xlu0 %v2596_v8 }
 0xca2   : > { %3486 = vmatpush3.bf16.msra.mxu1 %v3635_v29 }
 0xca4   : > { %2600 = vadd.xlane.f32.xlu0 %v2599_v37 }
 0xd25   : > { %v2592_v38 = vpop.xlane.xlu0 %2591 }
 0xd26   : > { %v2603_v39 = vmul.f32 0.03125, %v2592_v38 }
 0xd28   : > { %v2607_v40 = vsub.f32 %v2584_v24, %v2603_v39 }
 0xd29   : > { %v2595_v42 = vpop.xlane.xlu1 %2594  ;;  %v2598_v30 = vpop.xlane.xlu0 %2597 }
 0xd2a   : > { %v2604_v43 = vmul.f32 0.03125, %v2595_v42  ;;  %v2605_v44 = vmul.f32 0.03125, %v2598_v30  ;;  %v2611_v45 = vmul.f32 %v2607_v40, %v2607_v40 }
 0xd2c   : > { %v2608_v46 = vsub.f32 %v2585_v33, %v2604_v43  ;;  %v2609_v47 = vsub.f32 %v2586_v31, %v2605_v44  ;;  %v2615_v52 = vsel %vm624_vm0, %v2611_v45, 0.0  ;;  %v3636_v31 = vld [vmem:[%s4758_s10 + $0x8] sm:$0xff]  }
 0xd2d   : > { %2616 = vadd.xlane.f32.xlu1 %v2615_v52  ;;  %v2601_v41 = vpop.xlane.xlu0 %2600  ;;  %3487 = vmatprep.subr.bf16.mxu1 %v3636_v31  ;;  %v3163_v33 = vld [vmem:[#allocation10] ss:$0 sm:$0xff] }
 0xd2e   : > { %v2606_v48 = vmul.f32 0.03125, %v2601_v41  ;;  %v2612_v53 = vmul.f32 %v2608_v46, %v2608_v46  ;;  %v2613_v55 = vmul.f32 %v2609_v47, %v2609_v47  ;;  %3488 = vmatpush3.bf16.msra.mxu1 %v3636_v31 }
 0xd2f   : > { %3489 = vmatprep.subr.bf16.mxu1 %v3637_v32 }
 0xd30   : > { %v2610_v60 = vsub.f32 %v2587_v36, %v2606_v48  ;;  %v2618_v16 = vsel %vm624_vm0, %v2612_v53, 0.0  ;;  %v2621_v0 = vsel %vm624_vm0, %v2613_v55, 0.0 }
 0xd31   : > { %2619 = vadd.xlane.f32.xlu0 %v2618_v16  ;;  %2622 = vadd.xlane.f32.xlu1 %v2621_v0 }
 0xd32   : > { %v2614_v1 = vmul.f32 %v2610_v60, %v2610_v60  ;;  %3490 = vmatpush3.bf16.msra.mxu1 %v3637_v32 }
 0xd34   : > { %v2624_v2 = vsel %vm624_vm0, %v2614_v1, 0.0 }
 0xd35   : > { %2625 = vadd.xlane.f32.xlu0 %v2624_v2 }
 0xdb6   : > { %v2617_v9 = vpop.xlane.xlu1 %2616 }
 0xdb7   : > { %v2627_v10 = vmul.f32 0.03125, %v2617_v9 }
 0xdb9   : > { %v2631_v14 = vadd.f32 1e-12, %v2627_v10 }
 0xdba   : > { %v2623_v15 = vpop.xlane.xlu1 %2622  ;;  %v2620_v17 = vpop.xlane.xlu0 %2619 }
 0xdbb   : > { %3702 = vrsqrt.f32 %v2631_v14  ;;  %v2629_v18 = vmul.f32 0.03125, %v2623_v15  ;;  %v2628_v20 = vmul.f32 0.03125, %v2620_v17 }
 0xdbd   : > { %v2633_v13 = vadd.f32 1e-12, %v2629_v18  ;;  %v2632_v19 = vadd.f32 1e-12, %v2628_v20 }
 0xdbe   : > { %v2626_v62 = vpop.xlane.xlu0 %2625 }
 0xdbf   : > { %3704 = vrsqrt.f32 %v2633_v13  ;;  %v2630_v58 = vmul.f32 0.03125, %v2626_v62 }
 0xdc0   : > { %3706 = vrsqrt.f32 %v2632_v19 }
 0xdc1   : > { %v2634_v21 = vadd.f32 1e-12, %v2630_v58 }
 0xdc3   : > { %3708 = vrsqrt.f32 %v2634_v21 }
 0xdc8   : > { %v3703_v59 = vpop.eup %3702 }
 0xdc9   : > { %v2639_v61 = vmul.f32 %v3703_v59, %v2607_v40 }
 0xdcb   : > { %v2649_v49 = vmul.f32 %v3161_v63, %v2639_v61 }
 0xdcc   : > { %v3705_v6 = vpop.eup %3704 }
 0xdcd   : > { %v3707_v11 = vpop.eup %3706  ;;  %v2641_v12 = vmul.f32 %v3705_v6, %v2609_v47  ;;  %v4645_v56 = vadd.f32 %v3162_v50, %v2649_v49 }
 0xdce   : > { %v2640_v22 = vmul.f32 %v3707_v11, %v2608_v46 }
 0xdcf   : > { %v2651_v54 = vmul.f32 %v3161_v63, %v2641_v12 }
 0xdd0   : > { %v3709_v4 = vpop.eup %3708  ;;  %v2650_v3 = vmul.f32 %v3161_v63, %v2640_v22 }
 0xdd1   : > { %v2642_v51 = vmul.f32 %v3709_v4, %v2610_v60  ;;  %v4651_v25 = vadd.f32 %v3162_v50, %v2651_v54 }
 0xdd2   : > { %v4647_v57 = vadd.f32 %v3162_v50, %v2650_v3 }
 0xdd3   : > { %v2652_v23 = vmul.f32 %v3161_v63, %v2642_v51 }
 0xdd4   : > { %v2663_v24 = vpack.c.bf16 %v4647_v57, %v4645_v56 }
 0xdd5   : > { %v4653_v26 = vadd.f32 %v3162_v50, %v2652_v23  ;;  %v3168_v50 = vld [vmem:[%s4759_s11] ss:$0 sm:$0xff] }
 0xdd6   : > { %3479 = vmatprep.mubr.msk.bf16.mxu0 %vm624_vm0, %v2663_v24 }
 0xdd7   : > { %v2664_v27 = vpack.c.bf16 %v4653_v26, %v4651_v25 }
 0xdd9   : > { %3480 = vmatmul.mubr.msk.bf16.vlgmr.msra.gmra.mxu0 %vm624_vm0, %v2664_v27 }
 0xe99   : > { %v3481_v34 = vpop.f32.mrf.mxu0 }
 0xe9a   : > { %v2737_v8 = vadd.f32 %v3481_v34, %v3163_v33 }
 0xe9b   : > { %v2728_v35 = vpop.f32.mrf.mxu0 }
 0xe9c   : > { %v2749_v36 = vmul.f32 0.044715, %v2737_v8  ;;  %v2729_v37 = vadd.f32 %v3163_v33, %v2728_v35  ;;  %v2745_v59 = vmul.f32 0.5, %v2737_v8 }
 0xe9d   : > { %v3482_v38 = vpop.f32.mrf.mxu0 }
 0xe9e   : > { %v2753_v39 = vmul.f32 %v2749_v36, %v2737_v8  ;;  %v2747_v40 = vmul.f32 0.044715, %v2729_v37  ;;  %v2740_v42 = vadd.f32 %v3482_v38, %v3163_v33  ;;  %v2743_v62 = vmul.f32 0.5, %v2729_v37 }
 0xe9f   : > { %v2731_v30 = vpop.f32.mrf.mxu0 }
 0xea0   : > { %v2757_v43 = vmul.f32 %v2753_v39, %v2737_v8  ;;  %v2751_v44 = vmul.f32 %v2747_v40, %v2729_v37  ;;  %v2750_v45 = vmul.f32 0.044715, %v2740_v42  ;;  %v2732_v46 = vadd.f32 %v3163_v33, %v2731_v30 }
 0xea1   : > { %v2746_v13 = vmul.f32 0.5, %v2740_v42 }
 0xea2   : > { %v2761_v47 = vadd.f32 %v2757_v43, %v2737_v8  ;;  %v2755_v52 = vmul.f32 %v2751_v44, %v2729_v37  ;;  %v2754_v41 = vmul.f32 %v2750_v45, %v2740_v42  ;;  %v2748_v48 = vmul.f32 0.044715, %v2732_v46 }
 0xea3   : > { %v2744_v58 = vmul.f32 0.5, %v2732_v46 }
 0xea4   : > { %v2765_v53 = vmul.f32 0.7978846, %v2761_v47  ;;  %v2759_v55 = vadd.f32 %v2755_v52, %v2729_v37  ;;  %v2758_v60 = vmul.f32 %v2754_v41, %v2740_v42  ;;  %v2752_v16 = vmul.f32 %v2748_v48, %v2732_v46 }
 0xea6   : > { %v2763_v0 = vmul.f32 0.7978846, %v2759_v55  ;;  %v2762_v1 = vadd.f32 %v2758_v60, %v2740_v42  ;;  %v2756_v2 = vmul.f32 %v2752_v16, %v2732_v46  ;;  %3710 = vtanh.f32 %v2765_v53 }
 0xea8   : > { %v2766_v5 = vmul.f32 0.7978846, %v2762_v1  ;;  %3712 = vtanh.f32 %v2763_v0  ;;  %v2760_v7 = vadd.f32 %v2756_v2, %v2732_v46 }
 0xeaa   : > { %3714 = vtanh.f32 %v2766_v5  ;;  %v2764_v9 = vmul.f32 0.7978846, %v2760_v7 }
 0xeac   : > { %3716 = vtanh.f32 %v2764_v9 }
 0xeb3   : > { %v3711_v10 = vpop.eup %3710 }
 0xeb4   : > { %v2773_v19 = vadd.f32 1.0, %v3711_v10 }
 0xeb5   : > { %v3713_v14 = vpop.eup %3712 }
 0xeb6   : > { %v2771_v18 = vadd.f32 1.0, %v3713_v14  ;;  %v2777_v11 = vmul.f32 %v2773_v19, %v2745_v59 }
 0xeb7   : > { %v3715_v15 = vpop.eup %3714 }
 0xeb8   : > { %v2774_v17 = vadd.f32 1.0, %v3715_v15  ;;  %v2775_v63 = vmul.f32 %v2771_v18, %v2743_v62  ;;  %v3175_v18 = vld [vmem:[%s4760_s12] ss:$0 sm:$0xff] }
 0xeb9   : > { %v3717_v20 = vpop.eup %3716 }
 0xeba   : > { %v2772_v21 = vadd.f32 1.0, %v3717_v20  ;;  %v2778_v61 = vmul.f32 %v2774_v17, %v2746_v13  ;;  %v3176_v13 = vld [vmem:[%s4803_s6] ss:$0 sm:$0xff] }
 0xebc   : > { %v2776_v6 = vmul.f32 %v2772_v21, %v2744_v58  ;;  %v2780_v22 = vpack.c.bf16 %v2778_v61, %v2777_v11 }
 0xebe   : > { %v2779_v12 = vpack.c.bf16 %v2776_v6, %v2775_v63 }
 0xec0   : > { %3491 = vmatprep.mubr.msk.bf16.mxu1 %vm2820_vm6, %v2779_v12 }
 0xec1   : > { %3492 = vmatmul.mubr.msk.bf16.vlgmr.msra.gmra.mxu1 %vm2820_vm6, %v2780_v22 }
 0xf81   : > { %v3493_v49 = vpop.f32.mrf.mxu1 }
 0xf82   : > { %v2870_v3 = vadd.f32 %v3493_v49, %v3168_v50 }
 0xf83   : > { %v2861_v4 = vpop.f32.mrf.mxu1 }
 0xf84   : > { %v2862_v51 = vadd.f32 %v3168_v50, %v2861_v4  ;;  %v2878_v31 = vadd.f32 %v2870_v3, %v4651_v25 }
 0xf85   : > { %v3494_v54 = vpop.f32.mrf.mxu1 }
 0xf86   : > { %v2876_v23 = vadd.f32 %v2862_v51, %v4645_v56  ;;  %v2873_v27 = vadd.f32 %v3494_v54, %v3168_v50  ;;  %v2888_v34 = vsel %vm624_vm0, %v2878_v31, 0.0 }
 0xf87   : > { %v2864_v24 = vpop.f32.mrf.mxu1 }
 0xf88   : > { %v2865_v28 = vadd.f32 %v3168_v50, %v2864_v24  ;;  %v2882_v29 = vsel %vm624_vm0, %v2876_v23, 0.0  ;;  %v2879_v8 = vadd.f32 %v2873_v27, %v4653_v26 }
 0xf89   : > { %2883 = vadd.xlane.f32.xlu1 %v2882_v29 }
 0xf8a   : > { %v2877_v32 = vadd.f32 %v2865_v28, %v4647_v57  ;;  %v2891_v56 = vsel %vm624_vm0, %v2879_v8, 0.0 }
 0xf8c   : > { %v2885_v33 = vsel %vm624_vm0, %v2877_v32, 0.0 }
 0xf8d   : > { %2886 = vadd.xlane.f32.xlu0 %v2885_v33  ;;  %2889 = vadd.xlane.f32.xlu1 %v2888_v34 }
 0xf91   : > { %2892 = vadd.xlane.f32.xlu0 %v2891_v56 }
0x1012   : > { %v2884_v35 = vpop.xlane.xlu1 %2883 }
0x1013   : > { %v2894_v36 = vmul.f32 0.03125, %v2884_v35 }
0x1015   : > { %v2898_v37 = vsub.f32 %v2876_v23, %v2894_v36 }
0x1016   : > { %v2887_v38 = vpop.xlane.xlu0 %2886  ;;  %v2890_v39 = vpop.xlane.xlu1 %2889 }
0x1017   : > { %v2895_v25 = vmul.f32 0.03125, %v2887_v38  ;;  %v2896_v40 = vmul.f32 0.03125, %v2890_v39  ;;  %v2902_v42 = vmul.f32 %v2898_v37, %v2898_v37 }
0x1019   : > { %v2899_v57 = vsub.f32 %v2877_v32, %v2895_v25  ;;  %v2900_v30 = vsub.f32 %v2878_v31, %v2896_v40  ;;  %v2906_v43 = vsel %vm624_vm0, %v2902_v42, 0.0 }
0x101a   : > { %v2893_v44 = vpop.xlane.xlu0 %2892  ;;  %2907 = vadd.xlane.f32.xlu1 %v2906_v43 }
0x101b   : > { %v2897_v26 = vmul.f32 0.03125, %v2893_v44  ;;  %v2903_v45 = vmul.f32 %v2899_v57, %v2899_v57  ;;  %v2904_v46 = vmul.f32 %v2900_v30, %v2900_v30 }
0x101d   : > { %v2901_v47 = vsub.f32 %v2879_v8, %v2897_v26  ;;  %v2909_v52 = vsel %vm624_vm0, %v2903_v45, 0.0  ;;  %v2912_v41 = vsel %vm624_vm0, %v2904_v46, 0.0 }
0x101e   : > { %2910 = vadd.xlane.f32.xlu0 %v2909_v52  ;;  %2913 = vadd.xlane.f32.xlu1 %v2912_v41 }
0x101f   : > { %v2905_v48 = vmul.f32 %v2901_v47, %v2901_v47 }
0x1021   : > { %v2915_v53 = vsel %vm624_vm0, %v2905_v48, 0.0 }
0x1022   : > { %2916 = vadd.xlane.f32.xlu0 %v2915_v53 }
0x10a3   : > { %v2908_v55 = vpop.xlane.xlu1 %2907 }
0x10a4   : > { %v2918_v60 = vmul.f32 0.03125, %v2908_v55 }
0x10a6   : > { %v2922_v16 = vadd.f32 1e-12, %v2918_v60 }
0x10a7   : > { %v2911_v0 = vpop.xlane.xlu0 %2910  ;;  %v2914_v1 = vpop.xlane.xlu1 %2913 }
0x10a8   : > { %3718 = vrsqrt.f32 %v2922_v16  ;;  %v2919_v2 = vmul.f32 0.03125, %v2911_v0  ;;  %v2920_v5 = vmul.f32 0.03125, %v2914_v1 }
0x10aa   : > { %v2923_v7 = vadd.f32 1e-12, %v2919_v2  ;;  %v2924_v9 = vadd.f32 1e-12, %v2920_v5 }
0x10ab   : > { %v2917_v10 = vpop.xlane.xlu0 %2916 }
0x10ac   : > { %3720 = vrsqrt.f32 %v2923_v7  ;;  %v2921_v14 = vmul.f32 0.03125, %v2917_v10 }
0x10ad   : > { %3722 = vrsqrt.f32 %v2924_v9 }
0x10ae   : > { %v2925_v15 = vadd.f32 1e-12, %v2921_v14 }
0x10b0   : > { %3724 = vrsqrt.f32 %v2925_v15 }
0x10b5   : > { %v3719_v17 = vpop.eup %3718 }
0x10b6   : > { %v2930_v20 = vmul.f32 %v3719_v17, %v2898_v37 }
0x10b8   : > { %v2940_v19 = vmul.f32 %v3175_v18, %v2930_v20 }
0x10b9   : > { %v3721_v62 = vpop.eup %3720 }
0x10ba   : > { %v3723_v58 = vpop.eup %3722  ;;  %v2950_v21 = vadd.f32 %v3176_v13, %v2940_v19  ;;  %v2931_v59 = vmul.f32 %v3721_v62, %v2899_v57 }
0x10bb   : > { %v2932_v61 = vmul.f32 %v3723_v58, %v2900_v30 }
0x10bc   : > { %v2941_v63 = vmul.f32 %v3175_v18, %v2931_v59  ;;  %2954 = vst.msk [vmem:[%s562_s7] sm:$0xff] %vm624_vm0, %v2950_v21 }
0x10bd   : > { %v3725_v6 = vpop.eup %3724  ;;  %v2942_v11 = vmul.f32 %v3175_v18, %v2932_v61 }
0x10be   : > { %v2951_v12 = vadd.f32 %v3176_v13, %v2941_v63  ;;  %v2933_v22 = vmul.f32 %v3725_v6, %v2901_v47 }
0x10bf   : > { %v2952_v49 = vadd.f32 %v3176_v13, %v2942_v11 }
0x10c0   : > { %v2943_v50 = vmul.f32 %v3175_v18, %v2933_v22  ;;  %2955 = vst.msk [vmem:[%s562_s7 + $0x8] sm:$0xff] %vm624_vm0, %v2951_v12 }
0x10c1   : > { %2956 = vst.msk [vmem:[%s562_s7 + $0x10] sm:$0xff] %vm624_vm0, %v2952_v49 }
0x10c2   : > { %v2953_v4 = vadd.f32 %v3176_v13, %v2943_v50 }
0x10c4   : > { %2957 = vst.msk [vmem:[%s562_s7 + $0x18] sm:$0xff] %vm624_vm0, %v2953_v4 }
0x10c5   : > { %3877 = shalt.err (!%p3874_p3)
}
0x10c6   : > { %s3878_s27 = scalar_lea.hbm %s4701_s9, 512  ;;  %s3882_s28 = scalar_lea.hbm %s4805_s0, 1024 }
0x10c7   : > { %p3879_p10 = scmp.ne.s32.totalorder %s4701_s9, %s3878_s27  ;;  %p3883_p11 = scmp.lt.s32.totalorder %s4701_s9, %s4805_s0 }
0x10c8   : > { %p3884_p12 = scmp.lt.s32.totalorder %s3882_s28, %s3878_s27 }
0x10c9   : > { %p3880_p4 = pnand %p3879_p10, %p4806_p5 }
0x10ca   : > { %p3885_p13 = por %p3884_p12, %p3883_p11 }
0x10cb   : > { %p3881_p8 = pneg %p3880_p4 }
0x10cd   : > { %p3886_p0 = pnand %p3885_p13, %p3881_p8 }
0x10cf   : > { %3889 = shalt.err (!%p3886_p0)
}
0x10d0   : > { %s3968_s21 = smov 128  }
0x10d1   : > { %3511 = dma.vmem_to_hbm [thread:$0]  (%p4806_p5), %s4703_s22, 512, %s4701_s9, %s2959_s17, %s3968_s21, %s3968_s21, %s3964_s26  }
0x10d2 PF: > { %s4807_s15 = sld [smem:[#allocation17_spill]]  ;;  %p4810_p9 = scmp.ge.s32.totalorder %s3940_s16, 2 }
0x10d3   : > { %s4808_s19 = sld [smem:[#allocation19_spill]] }
0x10d8   : > { %s2987_s25 = sand.u32 1, %s4807_s15  }
0x10d9   : > { %p4809_p1 = scmp.ne.s32.totalorder %s4808_s19, 0  ;;  %s2988_s18 = scalar_lea.sflag [#allocation4], %s2987_s25 }
0x10db   : > { %p3531_p6 = pnand %p4810_p9, %p4809_p1 }
0x10dd   : > { %p3532_p7 = pneg %p3531_p6 }
0x10df   : > { %3923 = dma.done.wait (%p3532_p7), %s2988_s18, 512  }
0x10e0   : > { %3925 = vsyncadd (%p3532_p7), %s2988_s18, 4294966784  ;;  %s4811_s16 = sld [smem:[#allocation20_spill]]  ;;  %s4814_s29 = smov %s3932_s30 }
0x10e1   : > { %s4812_s14 = sld [smem:[#allocation18_spill]] }
0x10e2   : > { %s4813_s15 = sld [smem:[#allocation21_spill]] }
0x10e6   : > { %p31_p2 = scmp.ge.s32.totalorder %s4811_s16, 4  }
0x10e7   : > { %s4815_s30 = smov %s4812_s14 }
0x10e8   :  { %33 = sbr.rel (!%p31_p2) target bundleno = 15 (0xf), region = 146 }
0x10ed   :  { %2993 = vsyncpa [#allocation3], 1 }
0x10ee   :  { %2995 = vsyncpa [#allocation3 + $0x1], 1 }
0x10ef   :  { %2996 = vsyncpa [#allocation6], 1 }
0x10f0   :  { %2998 = vsyncpa [#allocation6 + $0x1], 1 }
0x10f1   :  { %2999 = vsyncpa [#allocation9], 1 }
0x10f2   :  { %3000 = vsyncpa [#allocation4], 1 }
0x10f3   :  { %3002 = vsyncpa [#allocation4 + $0x1], 1 }

</bundles_post_ra>
